<compile_context>
chip_gen: v7x
topology: tpu7x:2x2x1
jax: 0.10.0
libtpu: 0.0.40
codegen_flags: <defaults>
</compile_context>

<pallas_src>
import jax
import jax.numpy as jnp
import numpy as np
from jax.experimental import pallas as pl
from jax.experimental.pallas import tpu as pltpu

BN_EPS = 1e-5


def _make_kernel(num_blocks, has_proj):
    """Builds the fused forward kernel for a fixed block structure (eval mode)."""

    def kernel(*refs):
        # refs = [x, (per block: Wf, W2, vec), wr_row, br, out]
        out_ref = refs[-1]
        x = refs[0][...]                               # (Nt, Din) bf16 tile
        idx = 1
        for i in range(num_blocks):
            Wf = refs[idx][...]; idx += 1              # bf16: [W1|Wp] (in,2*dim) or W1 (in,dim)
            W2 = refs[idx][...]; idx += 1              # bf16: (dim, dim), BN2 folded
            vec = refs[idx][...]; idx += 1             # f32:  (3, dim) = [shift1, shift2, bp]
            dim = W2.shape[0]
            shift1, shift2, bp = vec[0:1, :], vec[1:2, :], vec[2:3, :]

            x_lo = x.astype(Wf.dtype)
            if has_proj[i]:
                # One fused MXU pass computes FC1 and the residual projection.
                fused = jnp.dot(x_lo, Wf, preferred_element_type=jnp.float32)
                h = fused[:, :dim] + shift1
                identity = fused[:, dim:] + bp
            else:
                h = jnp.dot(x_lo, Wf, preferred_element_type=jnp.float32) + shift1
                identity = x.astype(jnp.float32)

            # FC1(+bias, BN1 folded) -> ReLU -> Dropout (identity in eval)
            h = jnp.maximum(h, 0.0)
            # FC2(+bias, BN2 folded) -> residual add -> ReLU -> Dropout (identity)
            h = jnp.dot(h.astype(W2.dtype), W2, preferred_element_type=jnp.float32) + shift2
            x = jnp.maximum(h + identity, 0.0)

        wr = refs[idx][...]; idx += 1                  # (1, prev) f32
        br = refs[idx][...]; idx += 1                  # (1, 1)    f32
        # Final regressor as a lane reduction (keeps the width-1 matmul off the MXU).
        y = jnp.sum(x * wr, axis=-1, keepdims=True) + br
        out_ref[...] = y.astype(out_ref.dtype)

    return kernel


def init_params(key, input_dim, hidden_dims):
    """Deterministic synthetic parameters mirroring the PyTorch module shapes."""
    params = []
    prev = input_dim
    for dim in hidden_dims:
        key, *ks = jax.random.split(key, 11)
        blk = {
            # Linear weights stored pre-transposed: (in, out)
            "W1": jax.random.normal(ks[0], (prev, dim), jnp.float32)
                  * np.sqrt(2.0 / prev),                               # kaiming-ish
            "b1": jax.random.normal(ks[1], (1, dim), jnp.float32) * 0.01,
            "gamma1": 1.0 + 0.1 * jax.random.normal(ks[2], (1, dim), jnp.float32),
            "beta1": 0.1 * jax.random.normal(ks[3], (1, dim), jnp.float32),
            "rm1": 0.05 * jax.random.normal(ks[4], (1, dim), jnp.float32),
            "rv1": 0.5 + jnp.abs(jax.random.normal(ks[5], (1, dim), jnp.float32)),
            "W2": jax.random.normal(ks[6], (dim, dim), jnp.float32)
                  * np.sqrt(2.0 / dim),
            "b2": jax.random.normal(ks[7], (1, dim), jnp.float32) * 0.01,
            "gamma2": 1.0 + 0.1 * jax.random.normal(ks[8], (1, dim), jnp.float32),
            "beta2": 0.1 * jax.random.normal(ks[9], (1, dim), jnp.float32),
            "rm2": jnp.zeros((1, dim), jnp.float32),
            "rv2": jnp.ones((1, dim), jnp.float32),
        }
        if prev != dim:
            key, kp, kb = jax.random.split(key, 3)
            bound = np.sqrt(6.0 / (prev + dim))                        # xavier uniform
            blk["Wp"] = jax.random.uniform(kp, (prev, dim), jnp.float32,
                                           minval=-bound, maxval=bound)
            blk["bp"] = jax.random.normal(kb, (1, dim), jnp.float32) * 0.01
        params.append(blk)
        prev = dim

    key, kr, kb = jax.random.split(key, 3)
    bound = np.sqrt(6.0 / (prev + 1))
    regressor = {
        "Wr": jax.random.uniform(kr, (prev, 1), jnp.float32, minval=-bound, maxval=bound),
        "br": jax.random.normal(kb, (1, 1), jnp.float32) * 0.01,
    }
    return params, regressor


def _fold_bn(gamma, beta, rm, rv):
    scale = gamma / jnp.sqrt(rv + BN_EPS)
    shift = beta - rm * scale
    return scale, shift


def prepare_params(params, regressor, weight_dtype=jnp.bfloat16):
    """Fold eval-mode BN + bias into each linear, fuse [W1|Wp] for projection
    blocks, lane-pad block-0 input width to a 128 multiple, cast weights to
    weight_dtype, pack per-block shift vectors into one (3, dim) f32 array."""
    flat, has_proj = [], []
    for blk_idx, blk in enumerate(params):
        s1, t1 = _fold_bn(blk["gamma1"], blk["beta1"], blk["rm1"], blk["rv1"])
        s2, t2 = _fold_bn(blk["gamma2"], blk["beta2"], blk["rm2"], blk["rv2"])
        W1 = blk["W1"] * s1                                 # column scale folds BN1
        shift1 = blk["b1"] * s1 + t1
        W2 = (blk["W2"] * s2).astype(weight_dtype)          # column scale folds BN2
        shift2 = blk["b2"] * s2 + t2
        proj = "Wp" in blk
        has_proj.append(proj)
        if proj:
            Wf = jnp.concatenate([W1, blk["Wp"]], axis=1)   # fused [FC1 | proj]
            bp = blk["bp"]
        else:
            Wf = W1
            bp = jnp.zeros_like(shift1)
        if blk_idx == 0 and proj:
            # Lane-align the input width: zero cols on x (wrapper) <-> zero rows here.
            in_dim = Wf.shape[0]
            in_pad = int(pl.cdiv(in_dim, 128)) * 128
            if in_pad != in_dim:
                Wf = jnp.pad(Wf, ((0, in_pad - in_dim), (0, 0)))
        flat.append(Wf.astype(weight_dtype))
        flat.append(W2)
        flat.append(jnp.concatenate([shift1, shift2, bp], axis=0).astype(jnp.float32))
    flat.append(jnp.asarray(regressor["Wr"]).T.astype(jnp.float32))   # (1, prev)
    flat.append(jnp.asarray(regressor["br"]).astype(jnp.float32))     # (1, 1)
    return flat, tuple(has_proj)


def _vmem_limit_bytes():
    """Half of physical VMEM, clamped to [32, 64] MiB (v7x only has 64 MiB)."""
    mib = 1024 * 1024
    try:
        cap = int(pltpu.get_tpu_info().vmem_capacity_bytes)
    except Exception:
        cap = 128 * mib
    return int(min(64 * mib, max(32 * mib, cap // 2)))


def house_price_forward(x, flat_params, has_proj, n_tile=1024,
                        activation_dtype=jnp.bfloat16):
    """Batch-tiled fused forward. Weights stay VMEM-resident; x/out pipelined."""
    n = x.shape[0]
    # Match the (possibly 128-padded) input width of the block-0 weight.
    d_in_pad = flat_params[0].shape[0]
    if x.shape[1] != d_in_pad:
        x = jnp.pad(x, ((0, 0), (0, d_in_pad - x.shape[1])))
    x = x.astype(activation_dtype)

    # Batch tiling: large tiles (MXU-bound workload); when >1 tile, make the
    # grid even so v7x's two TensorCores split the "parallel" axis evenly.
    if n <= n_tile:
        num_tiles = 1
        tile = max(8, int(pl.cdiv(n, 8)) * 8)
    else:
        num_tiles = int(pl.cdiv(n, n_tile))
        if num_tiles % 2:
            num_tiles += 1
        tile = max(8, int(pl.cdiv(int(pl.cdiv(n, num_tiles)), 8)) * 8)
    n_pad = num_tiles * tile
    if n_pad != n:
        x = jnp.pad(x, ((0, n_pad - n), (0, 0)))

    kernel = _make_kernel(len(has_proj), has_proj)
    const_map = lambda i: (0, 0)          # weights: same block every step -> resident

    def build_call(single_buffer_weights):
        in_specs = [pl.BlockSpec((tile, d_in_pad), lambda i: (i, 0))]
        for p in flat_params:
            if single_buffer_weights:
                # Constant-index residents don't need double-buffering.
                in_specs.append(pl.BlockSpec(p.shape, const_map,
                                             pipeline_mode=pl.Buffered(1)))
            else:
                in_specs.append(pl.BlockSpec(p.shape, const_map))
        return pl.pallas_call(
            kernel,
            out_shape=jax.ShapeDtypeStruct((n_pad, 1), jnp.float32),
            grid=(num_tiles,),
            in_specs=in_specs,
            out_specs=pl.BlockSpec((tile, 1), lambda i: (i, 0)),
            compiler_params=pltpu.CompilerParams(
                dimension_semantics=("parallel",),       # v7x: both TensorCores
                vmem_limit_bytes=_vmem_limit_bytes(),    # generation-aware budget
            ),
        )

    try:
        out = jax.block_until_ready(build_call(True)(x, *flat_params))
    except Exception:
        # pipeline_mode=pl.Buffered(1) not supported on this jax version;
        # constant index_maps alone still keep the weights VMEM-resident.
        out = build_call(False)(x, *flat_params)
    return out[:n, 0]                                    # squeeze(-1)


def reference_forward(x, flat_params, has_proj, activation_dtype=jnp.bfloat16):
    """Pure-JAX reference using the same prepared (folded, bf16, fused) params."""
    d_in_pad = flat_params[0].shape[0]
    if x.shape[1] != d_in_pad:
        x = jnp.pad(x, ((0, 0), (0, d_in_pad - x.shape[1])))
    h = x.astype(activation_dtype)
    idx = 0
    for proj in has_proj:
        Wf = flat_params[idx]; idx += 1
        W2 = flat_params[idx]; idx += 1
        vec = flat_params[idx]; idx += 1
        dim = W2.shape[0]
        shift1, shift2, bp = vec[0:1, :], vec[1:2, :], vec[2:3, :]
        h_lo = h.astype(Wf.dtype)
        if proj:
            fused = jnp.dot(h_lo, Wf, preferred_element_type=jnp.float32)
            o = fused[:, :dim] + shift1
            identity = fused[:, dim:] + bp
        else:
            o = jnp.dot(h_lo, Wf, preferred_element_type=jnp.float32) + shift1
            identity = h.astype(jnp.float32)
        o = jnp.maximum(o, 0.0)
        o = jnp.dot(o.astype(W2.dtype), W2, preferred_element_type=jnp.float32) + shift2
        h = jnp.maximum(o + identity, 0.0)
    wr = flat_params[idx]; idx += 1
    br = flat_params[idx]; idx += 1
    return (jnp.sum(h * wr, axis=-1, keepdims=True) + br)[:, 0]


if __name__ == "__main__":
    key = jax.random.PRNGKey(0)
    batch = 8
    input_dim = 16
    hidden_dims = [32, 32, 16]  # small stand-in for the default [512, 512, 256, 256, 128]

    key, kx, kp = jax.random.split(key, 3)
    x = jax.random.normal(kx, (batch, input_dim), jnp.float32)
    params, regressor = init_params(kp, input_dim, hidden_dims)
    flat_params, has_proj = prepare_params(params, regressor, weight_dtype=jnp.bfloat16)

    y = house_price_forward(x, flat_params, has_proj)
    y = jax.block_until_ready(y)

    y_ref = reference_forward(x, flat_params, has_proj)
    np.testing.assert_allclose(np.asarray(y), np.asarray(y_ref), rtol=5e-3, atol=5e-3)

    print("KERNEL_OK")
</pallas_src>

<mosaic_0001>
module attributes {stable_mosaic.version = 11 : i64} {
  func.func @kernel(%arg0: i32, %arg1: memref<8x128xbf16, #tpu.memory_space<vmem>>, %arg2: memref<128x64xbf16, #tpu.memory_space<vmem>>, %arg3: memref<32x32xbf16, #tpu.memory_space<vmem>>, %arg4: memref<3x32xf32, #tpu.memory_space<vmem>>, %arg5: memref<32x32xbf16, #tpu.memory_space<vmem>>, %arg6: memref<32x32xbf16, #tpu.memory_space<vmem>>, %arg7: memref<3x32xf32, #tpu.memory_space<vmem>>, %arg8: memref<32x32xbf16, #tpu.memory_space<vmem>>, %arg9: memref<16x16xbf16, #tpu.memory_space<vmem>>, %arg10: memref<3x16xf32, #tpu.memory_space<vmem>>, %arg11: memref<1x16xf32, #tpu.memory_space<vmem>>, %arg12: memref<1x1xf32, #tpu.memory_space<vmem>>, %arg13: memref<8x1xf32, #tpu.memory_space<vmem>>) attributes {dimension_semantics = [#tpu.dimension_semantics<parallel>], iteration_bounds = array<i64: 1>, scalar_prefetch = 0 : i64, scratch_operands = 0 : i64, tpu.core_type = #tpu.core_type<tc>, window_params = [{transform_indices = @transform_0, window_bounds = array<i64: 8, 128>}, {pipeline_mode = #tpu.pipeline_mode<synchronous>, transform_indices = @transform_1, window_bounds = array<i64: 128, 64>}, {pipeline_mode = #tpu.pipeline_mode<synchronous>, transform_indices = @transform_2, window_bounds = array<i64: 32, 32>}, {pipeline_mode = #tpu.pipeline_mode<synchronous>, transform_indices = @transform_3, window_bounds = array<i64: 3, 32>}, {pipeline_mode = #tpu.pipeline_mode<synchronous>, transform_indices = @transform_4, window_bounds = array<i64: 32, 32>}, {pipeline_mode = #tpu.pipeline_mode<synchronous>, transform_indices = @transform_5, window_bounds = array<i64: 32, 32>}, {pipeline_mode = #tpu.pipeline_mode<synchronous>, transform_indices = @transform_6, window_bounds = array<i64: 3, 32>}, {pipeline_mode = #tpu.pipeline_mode<synchronous>, transform_indices = @transform_7, window_bounds = array<i64: 32, 32>}, {pipeline_mode = #tpu.pipeline_mode<synchronous>, transform_indices = @transform_8, window_bounds = array<i64: 16, 16>}, {pipeline_mode = #tpu.pipeline_mode<synchronous>, transform_indices = @transform_9, window_bounds = array<i64: 3, 16>}, {pipeline_mode = #tpu.pipeline_mode<synchronous>, transform_indices = @transform_10, window_bounds = array<i64: 1, 16>}, {pipeline_mode = #tpu.pipeline_mode<synchronous>, transform_indices = @transform_11, window_bounds = array<i64: 1, 1>}, {transform_indices = @transform_12, window_bounds = array<i64: 8, 1>}]} {
    %c0 = arith.constant 0 : index
    %c0_0 = arith.constant 0 : index
    %0 = vector.load %arg1[%c0, %c0_0] : memref<8x128xbf16, #tpu.memory_space<vmem>>, vector<8x128xbf16>
    %c0_1 = arith.constant 0 : index
    %c0_2 = arith.constant 0 : index
    %1 = vector.load %arg2[%c0_1, %c0_2] : memref<128x64xbf16, #tpu.memory_space<vmem>>, vector<128x64xbf16>
    %c0_3 = arith.constant 0 : index
    %c0_4 = arith.constant 0 : index
    %2 = vector.load %arg3[%c0_3, %c0_4] : memref<32x32xbf16, #tpu.memory_space<vmem>>, vector<32x32xbf16>
    %c0_5 = arith.constant 0 : index
    %c0_6 = arith.constant 0 : index
    %3 = vector.load %arg4[%c0_5, %c0_6] : memref<3x32xf32, #tpu.memory_space<vmem>>, vector<3x32xf32>
    %4 = vector.extract_strided_slice %3 {offsets = [0, 0], sizes = [1, 32], strides = [1, 1]} : vector<3x32xf32> to vector<1x32xf32>
    %5 = vector.extract_strided_slice %3 {offsets = [1, 0], sizes = [1, 32], strides = [1, 1]} : vector<3x32xf32> to vector<1x32xf32>
    %6 = vector.extract_strided_slice %3 {offsets = [2, 0], sizes = [1, 32], strides = [1, 1]} : vector<3x32xf32> to vector<1x32xf32>
    %cst = arith.constant dense<0.000000e+00> : vector<8x64xf32>
    %7 = tpu.matmul %0, %1, %cst {dimension_numbers = #tpu.dot_dimension_numbers<[1], [0], [0], [1], [0, 0, 1, 1], [], []>} : vector<8x128xbf16>, vector<128x64xbf16>, vector<8x64xf32> -> vector<8x64xf32>
    %8 = vector.extract_strided_slice %7 {offsets = [0, 0], sizes = [8, 32], strides = [1, 1]} : vector<8x64xf32> to vector<8x32xf32>
    %9 = vector.broadcast %4 : vector<1x32xf32> to vector<8x32xf32>
    %10 = arith.addf %8, %9 : vector<8x32xf32>
    %11 = vector.extract_strided_slice %7 {offsets = [0, 32], sizes = [8, 32], strides = [1, 1]} : vector<8x64xf32> to vector<8x32xf32>
    %12 = vector.broadcast %6 : vector<1x32xf32> to vector<8x32xf32>
    %13 = arith.addf %11, %12 : vector<8x32xf32>
    %cst_7 = arith.constant 0.000000e+00 : f32
    %14 = vector.broadcast %cst_7 : f32 to vector<8x32xf32>
    %15 = arith.maximumf %10, %14 : vector<8x32xf32>
    %16 = arith.truncf %15 : vector<8x32xf32> to vector<8x32xbf16>
    %cst_8 = arith.constant dense<0.000000e+00> : vector<8x32xf32>
    %17 = tpu.matmul %16, %2, %cst_8 {dimension_numbers = #tpu.dot_dimension_numbers<[1], [0], [0], [1], [0, 0, 1, 1], [], []>} : vector<8x32xbf16>, vector<32x32xbf16>, vector<8x32xf32> -> vector<8x32xf32>
    %18 = vector.broadcast %5 : vector<1x32xf32> to vector<8x32xf32>
    %19 = arith.addf %17, %18 : vector<8x32xf32>
    %20 = arith.addf %19, %13 : vector<8x32xf32>
    %cst_9 = arith.constant 0.000000e+00 : f32
    %21 = vector.broadcast %cst_9 : f32 to vector<8x32xf32>
    %22 = arith.maximumf %20, %21 : vector<8x32xf32>
    %c0_10 = arith.constant 0 : index
    %c0_11 = arith.constant 0 : index
    %23 = vector.load %arg5[%c0_10, %c0_11] : memref<32x32xbf16, #tpu.memory_space<vmem>>, vector<32x32xbf16>
    %c0_12 = arith.constant 0 : index
    %c0_13 = arith.constant 0 : index
    %24 = vector.load %arg6[%c0_12, %c0_13] : memref<32x32xbf16, #tpu.memory_space<vmem>>, vector<32x32xbf16>
    %c0_14 = arith.constant 0 : index
    %c0_15 = arith.constant 0 : index
    %25 = vector.load %arg7[%c0_14, %c0_15] : memref<3x32xf32, #tpu.memory_space<vmem>>, vector<3x32xf32>
    %26 = vector.extract_strided_slice %25 {offsets = [0, 0], sizes = [1, 32], strides = [1, 1]} : vector<3x32xf32> to vector<1x32xf32>
    %27 = vector.extract_strided_slice %25 {offsets = [1, 0], sizes = [1, 32], strides = [1, 1]} : vector<3x32xf32> to vector<1x32xf32>
    %28 = arith.truncf %22 : vector<8x32xf32> to vector<8x32xbf16>
    %cst_16 = arith.constant dense<0.000000e+00> : vector<8x32xf32>
    %29 = tpu.matmul %28, %23, %cst_16 {dimension_numbers = #tpu.dot_dimension_numbers<[1], [0], [0], [1], [0, 0, 1, 1], [], []>} : vector<8x32xbf16>, vector<32x32xbf16>, vector<8x32xf32> -> vector<8x32xf32>
    %30 = vector.broadcast %26 : vector<1x32xf32> to vector<8x32xf32>
    %31 = arith.addf %29, %30 : vector<8x32xf32>
    %cst_17 = arith.constant 0.000000e+00 : f32
    %32 = vector.broadcast %cst_17 : f32 to vector<8x32xf32>
    %33 = arith.maximumf %31, %32 : vector<8x32xf32>
    %34 = arith.truncf %33 : vector<8x32xf32> to vector<8x32xbf16>
    %cst_18 = arith.constant dense<0.000000e+00> : vector<8x32xf32>
    %35 = tpu.matmul %34, %24, %cst_18 {dimension_numbers = #tpu.dot_dimension_numbers<[1], [0], [0], [1], [0, 0, 1, 1], [], []>} : vector<8x32xbf16>, vector<32x32xbf16>, vector<8x32xf32> -> vector<8x32xf32>
    %36 = vector.broadcast %27 : vector<1x32xf32> to vector<8x32xf32>
    %37 = arith.addf %35, %36 : vector<8x32xf32>
    %38 = arith.addf %37, %22 : vector<8x32xf32>
    %cst_19 = arith.constant 0.000000e+00 : f32
    %39 = vector.broadcast %cst_19 : f32 to vector<8x32xf32>
    %40 = arith.maximumf %38, %39 : vector<8x32xf32>
    %c0_20 = arith.constant 0 : index
    %c0_21 = arith.constant 0 : index
    %41 = vector.load %arg8[%c0_20, %c0_21] : memref<32x32xbf16, #tpu.memory_space<vmem>>, vector<32x32xbf16>
    %c0_22 = arith.constant 0 : index
    %c0_23 = arith.constant 0 : index
    %42 = vector.load %arg9[%c0_22, %c0_23] : memref<16x16xbf16, #tpu.memory_space<vmem>>, vector<16x16xbf16>
    %c0_24 = arith.constant 0 : index
    %c0_25 = arith.constant 0 : index
    %43 = vector.load %arg10[%c0_24, %c0_25] : memref<3x16xf32, #tpu.memory_space<vmem>>, vector<3x16xf32>
    %44 = vector.extract_strided_slice %43 {offsets = [0, 0], sizes = [1, 16], strides = [1, 1]} : vector<3x16xf32> to vector<1x16xf32>
    %45 = vector.extract_strided_slice %43 {offsets = [1, 0], sizes = [1, 16], strides = [1, 1]} : vector<3x16xf32> to vector<1x16xf32>
    %46 = vector.extract_strided_slice %43 {offsets = [2, 0], sizes = [1, 16], strides = [1, 1]} : vector<3x16xf32> to vector<1x16xf32>
    %47 = arith.truncf %40 : vector<8x32xf32> to vector<8x32xbf16>
    %cst_26 = arith.constant dense<0.000000e+00> : vector<8x32xf32>
    %48 = tpu.matmul %47, %41, %cst_26 {dimension_numbers = #tpu.dot_dimension_numbers<[1], [0], [0], [1], [0, 0, 1, 1], [], []>} : vector<8x32xbf16>, vector<32x32xbf16>, vector<8x32xf32> -> vector<8x32xf32>
    %49 = vector.extract_strided_slice %48 {offsets = [0, 0], sizes = [8, 16], strides = [1, 1]} : vector<8x32xf32> to vector<8x16xf32>
    %50 = vector.broadcast %44 : vector<1x16xf32> to vector<8x16xf32>
    %51 = arith.addf %49, %50 : vector<8x16xf32>
    %52 = vector.extract_strided_slice %48 {offsets = [0, 16], sizes = [8, 16], strides = [1, 1]} : vector<8x32xf32> to vector<8x16xf32>
    %53 = vector.broadcast %46 : vector<1x16xf32> to vector<8x16xf32>
    %54 = arith.addf %52, %53 : vector<8x16xf32>
    %cst_27 = arith.constant 0.000000e+00 : f32
    %55 = vector.broadcast %cst_27 : f32 to vector<8x16xf32>
    %56 = arith.maximumf %51, %55 : vector<8x16xf32>
    %57 = arith.truncf %56 : vector<8x16xf32> to vector<8x16xbf16>
    %cst_28 = arith.constant dense<0.000000e+00> : vector<8x16xf32>
    %58 = tpu.matmul %57, %42, %cst_28 {dimension_numbers = #tpu.dot_dimension_numbers<[1], [0], [0], [1], [0, 0, 1, 1], [], []>} : vector<8x16xbf16>, vector<16x16xbf16>, vector<8x16xf32> -> vector<8x16xf32>
    %59 = vector.broadcast %45 : vector<1x16xf32> to vector<8x16xf32>
    %60 = arith.addf %58, %59 : vector<8x16xf32>
    %61 = arith.addf %60, %54 : vector<8x16xf32>
    %cst_29 = arith.constant 0.000000e+00 : f32
    %62 = vector.broadcast %cst_29 : f32 to vector<8x16xf32>
    %63 = arith.maximumf %61, %62 : vector<8x16xf32>
    %c0_30 = arith.constant 0 : index
    %c0_31 = arith.constant 0 : index
    %64 = vector.load %arg11[%c0_30, %c0_31] : memref<1x16xf32, #tpu.memory_space<vmem>>, vector<1x16xf32>
    %c0_32 = arith.constant 0 : index
    %c0_33 = arith.constant 0 : index
    %65 = vector.load %arg12[%c0_32, %c0_33] : memref<1x1xf32, #tpu.memory_space<vmem>>, vector<1x1xf32>
    %66 = vector.broadcast %64 : vector<1x16xf32> to vector<8x16xf32>
    %67 = arith.mulf %63, %66 : vector<8x16xf32>
    %cst_34 = arith.constant dense<0.000000e+00> : vector<8xf32>
    %68 = vector.multi_reduction <add>, %67, %cst_34 [1] : vector<8x16xf32> to vector<8xf32>
    %69 = vector.shape_cast %68 : vector<8xf32> to vector<8x1xf32>
    %70 = vector.broadcast %65 : vector<1x1xf32> to vector<8x1xf32>
    %71 = arith.addf %69, %70 : vector<8x1xf32>
    %c0_35 = arith.constant 0 : index
    %c0_36 = arith.constant 0 : index
    %72 = vector.load %arg13[%c0_35, %c0_36] : memref<8x1xf32, #tpu.memory_space<vmem>>, vector<8x1xf32>
    tpu.vector_store %arg13[%c0_35, %c0_36], %71 {strides = array<i32>} : memref<8x1xf32, #tpu.memory_space<vmem>>, vector<8x1xf32>,
    return
  }
  func.func @transform_0(%arg0: i32) -> (i32, i32) {
    %c0_i32 = arith.constant 0 : i32
    %c0_i32_0 = arith.constant 0 : i32
    return %arg0, %c0_i32 : i32, i32
  }
  func.func @transform_1(%arg0: i32) -> (i32, i32) {
    %c0_i32 = arith.constant 0 : i32
    %c0_i32_0 = arith.constant 0 : i32
    %c0_i32_1 = arith.constant 0 : i32
    return %c0_i32, %c0_i32_0 : i32, i32
  }
  func.func @transform_2(%arg0: i32) -> (i32, i32) {
    %c0_i32 = arith.constant 0 : i32
    %c0_i32_0 = arith.constant 0 : i32
    %c0_i32_1 = arith.constant 0 : i32
    return %c0_i32, %c0_i32_0 : i32, i32
  }
  func.func @transform_3(%arg0: i32) -> (i32, i32) {
    %c0_i32 = arith.constant 0 : i32
    %c0_i32_0 = arith.constant 0 : i32
    %c0_i32_1 = arith.constant 0 : i32
    return %c0_i32, %c0_i32_0 : i32, i32
  }
  func.func @transform_4(%arg0: i32) -> (i32, i32) {
    %c0_i32 = arith.constant 0 : i32
    %c0_i32_0 = arith.constant 0 : i32
    %c0_i32_1 = arith.constant 0 : i32
    return %c0_i32, %c0_i32_0 : i32, i32
  }
  func.func @transform_5(%arg0: i32) -> (i32, i32) {
    %c0_i32 = arith.constant 0 : i32
    %c0_i32_0 = arith.constant 0 : i32
    %c0_i32_1 = arith.constant 0 : i32
    return %c0_i32, %c0_i32_0 : i32, i32
  }
  func.func @transform_6(%arg0: i32) -> (i32, i32) {
    %c0_i32 = arith.constant 0 : i32
    %c0_i32_0 = arith.constant 0 : i32
    %c0_i32_1 = arith.constant 0 : i32
    return %c0_i32, %c0_i32_0 : i32, i32
  }
  func.func @transform_7(%arg0: i32) -> (i32, i32) {
    %c0_i32 = arith.constant 0 : i32
    %c0_i32_0 = arith.constant 0 : i32
    %c0_i32_1 = arith.constant 0 : i32
    return %c0_i32, %c0_i32_0 : i32, i32
  }
  func.func @transform_8(%arg0: i32) -> (i32, i32) {
    %c0_i32 = arith.constant 0 : i32
    %c0_i32_0 = arith.constant 0 : i32
    %c0_i32_1 = arith.constant 0 : i32
    return %c0_i32, %c0_i32_0 : i32, i32
  }
  func.func @transform_9(%arg0: i32) -> (i32, i32) {
    %c0_i32 = arith.constant 0 : i32
    %c0_i32_0 = arith.constant 0 : i32
    %c0_i32_1 = arith.constant 0 : i32
    return %c0_i32, %c0_i32_0 : i32, i32
  }
  func.func @transform_10(%arg0: i32) -> (i32, i32) {
    %c0_i32 = arith.constant 0 : i32
    %c0_i32_0 = arith.constant 0 : i32
    %c0_i32_1 = arith.constant 0 : i32
    return %c0_i32, %c0_i32_0 : i32, i32
  }
  func.func @transform_11(%arg0: i32) -> (i32, i32) {
    %c0_i32 = arith.constant 0 : i32
    %c0_i32_0 = arith.constant 0 : i32
    %c0_i32_1 = arith.constant 0 : i32
    return %c0_i32, %c0_i32_0 : i32, i32
  }
  func.func @transform_12(%arg0: i32) -> (i32, i32) {
    %c0_i32 = arith.constant 0 : i32
    %c0_i32_0 = arith.constant 0 : i32
    return %arg0, %c0_i32 : i32, i32
  }
}

module attributes {stable_mosaic.version = 11 : i64} {
  func.func @kernel(%arg0: i32, %arg1: memref<8x128xbf16, #tpu.memory_space<vmem>>, %arg2: memref<128x64xbf16, #tpu.memory_space<vmem>>, %arg3: memref<32x32xbf16, #tpu.memory_space<vmem>>, %arg4: memref<3x32xf32, #tpu.memory_space<vmem>>, %arg5: memref<32x32xbf16, #tpu.memory_space<vmem>>, %arg6: memref<32x32xbf16, #tpu.memory_space<vmem>>, %arg7: memref<3x32xf32, #tpu.memory_space<vmem>>, %arg8: memref<32x32xbf16, #tpu.memory_space<vmem>>, %arg9: memref<16x16xbf16, #tpu.memory_space<vmem>>, %arg10: memref<3x16xf32, #tpu.memory_space<vmem>>, %arg11: memref<1x16xf32, #tpu.memory_space<vmem>>, %arg12: memref<1x1xf32, #tpu.memory_space<vmem>>, %arg13: memref<8x1xf32, #tpu.memory_space<vmem>>) attributes {dimension_semantics = [#tpu.dimension_semantics<parallel>], iteration_bounds = array<i64: 1>, scalar_prefetch = 0 : i64, scratch_operands = 0 : i64, tpu.core_type = #tpu.core_type<tc>, window_params = [{transform_indices = @transform_0, window_bounds = array<i64: 8, 128>}, {pipeline_mode = #tpu.pipeline_mode<synchronous>, transform_indices = @transform_1, window_bounds = array<i64: 128, 64>}, {pipeline_mode = #tpu.pipeline_mode<synchronous>, transform_indices = @transform_2, window_bounds = array<i64: 32, 32>}, {pipeline_mode = #tpu.pipeline_mode<synchronous>, transform_indices = @transform_3, window_bounds = array<i64: 3, 32>}, {pipeline_mode = #tpu.pipeline_mode<synchronous>, transform_indices = @transform_4, window_bounds = array<i64: 32, 32>}, {pipeline_mode = #tpu.pipeline_mode<synchronous>, transform_indices = @transform_5, window_bounds = array<i64: 32, 32>}, {pipeline_mode = #tpu.pipeline_mode<synchronous>, transform_indices = @transform_6, window_bounds = array<i64: 3, 32>}, {pipeline_mode = #tpu.pipeline_mode<synchronous>, transform_indices = @transform_7, window_bounds = array<i64: 32, 32>}, {pipeline_mode = #tpu.pipeline_mode<synchronous>, transform_indices = @transform_8, window_bounds = array<i64: 16, 16>}, {pipeline_mode = #tpu.pipeline_mode<synchronous>, transform_indices = @transform_9, window_bounds = array<i64: 3, 16>}, {pipeline_mode = #tpu.pipeline_mode<synchronous>, transform_indices = @transform_10, window_bounds = array<i64: 1, 16>}, {pipeline_mode = #tpu.pipeline_mode<synchronous>, transform_indices = @transform_11, window_bounds = array<i64: 1, 1>}, {transform_indices = @transform_12, window_bounds = array<i64: 8, 1>}]} {
    %c0 = arith.constant 0 : index
    %c0_0 = arith.constant 0 : index
    %0 = vector.load %arg1[%c0, %c0_0] : memref<8x128xbf16, #tpu.memory_space<vmem>>, vector<8x128xbf16>
    %c0_1 = arith.constant 0 : index
    %c0_2 = arith.constant 0 : index
    %1 = vector.load %arg2[%c0_1, %c0_2] : memref<128x64xbf16, #tpu.memory_space<vmem>>, vector<128x64xbf16>
    %c0_3 = arith.constant 0 : index
    %c0_4 = arith.constant 0 : index
    %2 = vector.load %arg3[%c0_3, %c0_4] : memref<32x32xbf16, #tpu.memory_space<vmem>>, vector<32x32xbf16>
    %c0_5 = arith.constant 0 : index
    %c0_6 = arith.constant 0 : index
    %3 = vector.load %arg4[%c0_5, %c0_6] : memref<3x32xf32, #tpu.memory_space<vmem>>, vector<3x32xf32>
    %4 = vector.extract_strided_slice %3 {offsets = [0, 0], sizes = [1, 32], strides = [1, 1]} : vector<3x32xf32> to vector<1x32xf32>
    %5 = vector.extract_strided_slice %3 {offsets = [1, 0], sizes = [1, 32], strides = [1, 1]} : vector<3x32xf32> to vector<1x32xf32>
    %6 = vector.extract_strided_slice %3 {offsets = [2, 0], sizes = [1, 32], strides = [1, 1]} : vector<3x32xf32> to vector<1x32xf32>
    %cst = arith.constant dense<0.000000e+00> : vector<8x64xf32>
    %7 = tpu.matmul %0, %1, %cst {dimension_numbers = #tpu.dot_dimension_numbers<[1], [0], [0], [1], [0, 0, 1, 1], [], []>} : vector<8x128xbf16>, vector<128x64xbf16>, vector<8x64xf32> -> vector<8x64xf32>
    %8 = vector.extract_strided_slice %7 {offsets = [0, 0], sizes = [8, 32], strides = [1, 1]} : vector<8x64xf32> to vector<8x32xf32>
    %9 = vector.broadcast %4 : vector<1x32xf32> to vector<8x32xf32>
    %10 = arith.addf %8, %9 : vector<8x32xf32>
    %11 = vector.extract_strided_slice %7 {offsets = [0, 32], sizes = [8, 32], strides = [1, 1]} : vector<8x64xf32> to vector<8x32xf32>
    %12 = vector.broadcast %6 : vector<1x32xf32> to vector<8x32xf32>
    %13 = arith.addf %11, %12 : vector<8x32xf32>
    %cst_7 = arith.constant 0.000000e+00 : f32
    %14 = vector.broadcast %cst_7 : f32 to vector<8x32xf32>
    %15 = arith.maximumf %10, %14 : vector<8x32xf32>
    %16 = arith.truncf %15 : vector<8x32xf32> to vector<8x32xbf16>
    %cst_8 = arith.constant dense<0.000000e+00> : vector<8x32xf32>
    %17 = tpu.matmul %16, %2, %cst_8 {dimension_numbers = #tpu.dot_dimension_numbers<[1], [0], [0], [1], [0, 0, 1, 1], [], []>} : vector<8x32xbf16>, vector<32x32xbf16>, vector<8x32xf32> -> vector<8x32xf32>
    %18 = vector.broadcast %5 : vector<1x32xf32> to vector<8x32xf32>
    %19 = arith.addf %17, %18 : vector<8x32xf32>
    %20 = arith.addf %19, %13 : vector<8x32xf32>
    %cst_9 = arith.constant 0.000000e+00 : f32
    %21 = vector.broadcast %cst_9 : f32 to vector<8x32xf32>
    %22 = arith.maximumf %20, %21 : vector<8x32xf32>
    %c0_10 = arith.constant 0 : index
    %c0_11 = arith.constant 0 : index
    %23 = vector.load %arg5[%c0_10, %c0_11] : memref<32x32xbf16, #tpu.memory_space<vmem>>, vector<32x32xbf16>
    %c0_12 = arith.constant 0 : index
    %c0_13 = arith.constant 0 : index
    %24 = vector.load %arg6[%c0_12, %c0_13] : memref<32x32xbf16, #tpu.memory_space<vmem>>, vector<32x32xbf16>
    %c0_14 = arith.constant 0 : index
    %c0_15 = arith.constant 0 : index
    %25 = vector.load %arg7[%c0_14, %c0_15] : memref<3x32xf32, #tpu.memory_space<vmem>>, vector<3x32xf32>
    %26 = vector.extract_strided_slice %25 {offsets = [0, 0], sizes = [1, 32], strides = [1, 1]} : vector<3x32xf32> to vector<1x32xf32>
    %27 = vector.extract_strided_slice %25 {offsets = [1, 0], sizes = [1, 32], strides = [1, 1]} : vector<3x32xf32> to vector<1x32xf32>
    %28 = arith.truncf %22 : vector<8x32xf32> to vector<8x32xbf16>
    %cst_16 = arith.constant dense<0.000000e+00> : vector<8x32xf32>
    %29 = tpu.matmul %28, %23, %cst_16 {dimension_numbers = #tpu.dot_dimension_numbers<[1], [0], [0], [1], [0, 0, 1, 1], [], []>} : vector<8x32xbf16>, vector<32x32xbf16>, vector<8x32xf32> -> vector<8x32xf32>
    %30 = vector.broadcast %26 : vector<1x32xf32> to vector<8x32xf32>
    %31 = arith.addf %29, %30 : vector<8x32xf32>
    %cst_17 = arith.constant 0.000000e+00 : f32
    %32 = vector.broadcast %cst_17 : f32 to vector<8x32xf32>
    %33 = arith.maximumf %31, %32 : vector<8x32xf32>
    %34 = arith.truncf %33 : vector<8x32xf32> to vector<8x32xbf16>
    %cst_18 = arith.constant dense<0.000000e+00> : vector<8x32xf32>
    %35 = tpu.matmul %34, %24, %cst_18 {dimension_numbers = #tpu.dot_dimension_numbers<[1], [0], [0], [1], [0, 0, 1, 1], [], []>} : vector<8x32xbf16>, vector<32x32xbf16>, vector<8x32xf32> -> vector<8x32xf32>
    %36 = vector.broadcast %27 : vector<1x32xf32> to vector<8x32xf32>
    %37 = arith.addf %35, %36 : vector<8x32xf32>
    %38 = arith.addf %37, %22 : vector<8x32xf32>
    %cst_19 = arith.constant 0.000000e+00 : f32
    %39 = vector.broadcast %cst_19 : f32 to vector<8x32xf32>
    %40 = arith.maximumf %38, %39 : vector<8x32xf32>
    %c0_20 = arith.constant 0 : index
    %c0_21 = arith.constant 0 : index
    %41 = vector.load %arg8[%c0_20, %c0_21] : memref<32x32xbf16, #tpu.memory_space<vmem>>, vector<32x32xbf16>
    %c0_22 = arith.constant 0 : index
    %c0_23 = arith.constant 0 : index
    %42 = vector.load %arg9[%c0_22, %c0_23] : memref<16x16xbf16, #tpu.memory_space<vmem>>, vector<16x16xbf16>
    %c0_24 = arith.constant 0 : index
    %c0_25 = arith.constant 0 : index
    %43 = vector.load %arg10[%c0_24, %c0_25] : memref<3x16xf32, #tpu.memory_space<vmem>>, vector<3x16xf32>
    %44 = vector.extract_strided_slice %43 {offsets = [0, 0], sizes = [1, 16], strides = [1, 1]} : vector<3x16xf32> to vector<1x16xf32>
    %45 = vector.extract_strided_slice %43 {offsets = [1, 0], sizes = [1, 16], strides = [1, 1]} : vector<3x16xf32> to vector<1x16xf32>
    %46 = vector.extract_strided_slice %43 {offsets = [2, 0], sizes = [1, 16], strides = [1, 1]} : vector<3x16xf32> to vector<1x16xf32>
    %47 = arith.truncf %40 : vector<8x32xf32> to vector<8x32xbf16>
    %cst_26 = arith.constant dense<0.000000e+00> : vector<8x32xf32>
    %48 = tpu.matmul %47, %41, %cst_26 {dimension_numbers = #tpu.dot_dimension_numbers<[1], [0], [0], [1], [0, 0, 1, 1], [], []>} : vector<8x32xbf16>, vector<32x32xbf16>, vector<8x32xf32> -> vector<8x32xf32>
    %49 = vector.extract_strided_slice %48 {offsets = [0, 0], sizes = [8, 16], strides = [1, 1]} : vector<8x32xf32> to vector<8x16xf32>
    %50 = vector.broadcast %44 : vector<1x16xf32> to vector<8x16xf32>
    %51 = arith.addf %49, %50 : vector<8x16xf32>
    %52 = vector.extract_strided_slice %48 {offsets = [0, 16], sizes = [8, 16], strides = [1, 1]} : vector<8x32xf32> to vector<8x16xf32>
    %53 = vector.broadcast %46 : vector<1x16xf32> to vector<8x16xf32>
    %54 = arith.addf %52, %53 : vector<8x16xf32>
    %cst_27 = arith.constant 0.000000e+00 : f32
    %55 = vector.broadcast %cst_27 : f32 to vector<8x16xf32>
    %56 = arith.maximumf %51, %55 : vector<8x16xf32>
    %57 = arith.truncf %56 : vector<8x16xf32> to vector<8x16xbf16>
    %cst_28 = arith.constant dense<0.000000e+00> : vector<8x16xf32>
    %58 = tpu.matmul %57, %42, %cst_28 {dimension_numbers = #tpu.dot_dimension_numbers<[1], [0], [0], [1], [0, 0, 1, 1], [], []>} : vector<8x16xbf16>, vector<16x16xbf16>, vector<8x16xf32> -> vector<8x16xf32>
    %59 = vector.broadcast %45 : vector<1x16xf32> to vector<8x16xf32>
    %60 = arith.addf %58, %59 : vector<8x16xf32>
    %61 = arith.addf %60, %54 : vector<8x16xf32>
    %cst_29 = arith.constant 0.000000e+00 : f32
    %62 = vector.broadcast %cst_29 : f32 to vector<8x16xf32>
    %63 = arith.maximumf %61, %62 : vector<8x16xf32>
    %c0_30 = arith.constant 0 : index
    %c0_31 = arith.constant 0 : index
    %64 = vector.load %arg11[%c0_30, %c0_31] : memref<1x16xf32, #tpu.memory_space<vmem>>, vector<1x16xf32>
    %c0_32 = arith.constant 0 : index
    %c0_33 = arith.constant 0 : index
    %65 = vector.load %arg12[%c0_32, %c0_33] : memref<1x1xf32, #tpu.memory_space<vmem>>, vector<1x1xf32>
    %66 = vector.broadcast %64 : vector<1x16xf32> to vector<8x16xf32>
    %67 = arith.mulf %63, %66 : vector<8x16xf32>
    %cst_34 = arith.constant dense<0.000000e+00> : vector<8xf32>
    %68 = vector.multi_reduction <add>, %67, %cst_34 [1] : vector<8x16xf32> to vector<8xf32>
    %69 = vector.shape_cast %68 : vector<8xf32> to vector<8x1xf32>
    %70 = vector.broadcast %65 : vector<1x1xf32> to vector<8x1xf32>
    %71 = arith.addf %69, %70 : vector<8x1xf32>
    %c0_35 = arith.constant 0 : index
    %c0_36 = arith.constant 0 : index
    %72 = vector.load %arg13[%c0_35, %c0_36] : memref<8x1xf32, #tpu.memory_space<vmem>>, vector<8x1xf32>
    tpu.vector_store %arg13[%c0_35, %c0_36], %71 {strides = array<i32>} : memref<8x1xf32, #tpu.memory_space<vmem>>, vector<8x1xf32>,
    return
  }
  func.func @transform_0(%arg0: i32) -> (i32, i32) {
    %c0_i32 = arith.constant 0 : i32
    %c0_i32_0 = arith.constant 0 : i32
    return %arg0, %c0_i32 : i32, i32
  }
  func.func @transform_1(%arg0: i32) -> (i32, i32) {
    %c0_i32 = arith.constant 0 : i32
    %c0_i32_0 = arith.constant 0 : i32
    %c0_i32_1 = arith.constant 0 : i32
    return %c0_i32, %c0_i32_0 : i32, i32
  }
  func.func @transform_2(%arg0: i32) -> (i32, i32) {
    %c0_i32 = arith.constant 0 : i32
    %c0_i32_0 = arith.constant 0 : i32
    %c0_i32_1 = arith.constant 0 : i32
    return %c0_i32, %c0_i32_0 : i32, i32
  }
  func.func @transform_3(%arg0: i32) -> (i32, i32) {
    %c0_i32 = arith.constant 0 : i32
    %c0_i32_0 = arith.constant 0 : i32
    %c0_i32_1 = arith.constant 0 : i32
    return %c0_i32, %c0_i32_0 : i32, i32
  }
  func.func @transform_4(%arg0: i32) -> (i32, i32) {
    %c0_i32 = arith.constant 0 : i32
    %c0_i32_0 = arith.constant 0 : i32
    %c0_i32_1 = arith.constant 0 : i32
    return %c0_i32, %c0_i32_0 : i32, i32
  }
  func.func @transform_5(%arg0: i32) -> (i32, i32) {
    %c0_i32 = arith.constant 0 : i32
    %c0_i32_0 = arith.constant 0 : i32
    %c0_i32_1 = arith.constant 0 : i32
    return %c0_i32, %c0_i32_0 : i32, i32
  }
  func.func @transform_6(%arg0: i32) -> (i32, i32) {
    %c0_i32 = arith.constant 0 : i32
    %c0_i32_0 = arith.constant 0 : i32
    %c0_i32_1 = arith.constant 0 : i32
    return %c0_i32, %c0_i32_0 : i32, i32
  }
  func.func @transform_7(%arg0: i32) -> (i32, i32) {
    %c0_i32 = arith.constant 0 : i32
    %c0_i32_0 = arith.constant 0 : i32
    %c0_i32_1 = arith.constant 0 : i32
    return %c0_i32, %c0_i32_0 : i32, i32
  }
  func.func @transform_8(%arg0: i32) -> (i32, i32) {
    %c0_i32 = arith.constant 0 : i32
    %c0_i32_0 = arith.constant 0 : i32
    %c0_i32_1 = arith.constant 0 : i32
    return %c0_i32, %c0_i32_0 : i32, i32
  }
  func.func @transform_9(%arg0: i32) -> (i32, i32) {
    %c0_i32 = arith.constant 0 : i32
    %c0_i32_0 = arith.constant 0 : i32
    %c0_i32_1 = arith.constant 0 : i32
    return %c0_i32, %c0_i32_0 : i32, i32
  }
  func.func @transform_10(%arg0: i32) -> (i32, i32) {
    %c0_i32 = arith.constant 0 : i32
    %c0_i32_0 = arith.constant 0 : i32
    %c0_i32_1 = arith.constant 0 : i32
    return %c0_i32, %c0_i32_0 : i32, i32
  }
  func.func @transform_11(%arg0: i32) -> (i32, i32) {
    %c0_i32 = arith.constant 0 : i32
    %c0_i32_0 = arith.constant 0 : i32
    %c0_i32_1 = arith.constant 0 : i32
    return %c0_i32, %c0_i32_0 : i32, i32
  }
  func.func @transform_12(%arg0: i32) -> (i32, i32) {
    %c0_i32 = arith.constant 0 : i32
    %c0_i32_0 = arith.constant 0 : i32
    return %arg0, %c0_i32 : i32, i32
  }
}

</mosaic_0001>

<bundles_post_ra>
// kernel: tpu_custom_call.1
= control target key start
LH: loop header
LB: loop body
LE: loop exit
PB: predicated region body
PF: predicated region fallthrough
CT: control target
= control target key end

     0   :  { %s1410_s0 = inlined_call_operand.hbm [shape: bf16[8,128], index: 0, kind: input, shape index: {}]   ;;  %s1411_s1 = inlined_call_operand.hbm [shape: bf16[128,64], index: 1, kind: input, shape index: {}]   ;;  %s1412_s2 = inlined_call_operand.hbm [shape: bf16[32,32], index: 2, kind: input, shape index: {}]   ;;  %s1413_s3 = inlined_call_operand.hbm [shape: f32[3,32], index: 3, kind: input, shape index: {}]   ;;  %s1414_s4 = inlined_call_operand.hbm [shape: bf16[32,32], index: 4, kind: input, shape index: {}]   ;;  %s1415_s5 = inlined_call_operand.hbm [shape: bf16[32,32], index: 5, kind: input, shape index: {}]   ;;  %s1416_s6 = inlined_call_operand.hbm [shape: f32[3,32], index: 6, kind: input, shape index: {}]   ;;  %s1417_s7 = inlined_call_operand.hbm [shape: bf16[32,32], index: 7, kind: input, shape index: {}]   ;;  %s1418_s8 = inlined_call_operand.hbm [shape: bf16[16,16], index: 8, kind: input, shape index: {}]   ;;  %s1419_s9 = inlined_call_operand.hbm [shape: f32[3,16], index: 9, kind: input, shape index: {}]   ;;  %s1420_s10 = inlined_call_operand.hbm [shape: f32[1,16], index: 10, kind: input, shape index: {}]   ;;  %s1421_s11 = inlined_call_operand.<no memory space> [shape: f32[1,1], index: 11, kind: input, shape index: {}]   ;;  %s1422_s12 = inlined_call_operand.hbm [shape: f32[8,1], index: 12, kind: output, shape index: {}]  }
   0x1   :  { %v17_v0 = vstv %s1421_s11 }
   0x2   :  { %18 = vst [vmem:[#allocation2] sm:$0x1] %v17_v0 }
   0x3   :  { %19 = vsyncpa [#allocation4], 0 }
   0x4   :  { %20 = vsyncpa [#allocation7], 0 }
   0x5   :  { %21 = vsyncpa [#allocation10], 0 }
   0x6   :  { %22 = vsyncpa [#allocation13], 0 }
   0x7   :  { %23 = vsyncpa [#allocation16], 0 }
   0x8   :  { %24 = vsyncpa [#allocation19], 0 }
   0x9   :  { %25 = vsyncpa [#allocation5], 0  ;;  %s1108_s23 = smov [#allocation6]   ;;  %s830_s27 = scalar_lea.hbm %s1411_s1, 1024 }
   0xa   :  { %s41_s24 = sshll.u32 %s1108_s23, 4  ;;  %p831_p0 = scmp.ne.s32.totalorder %s1411_s1, %s830_s27  ;;  %s42_s24 = int_to_ptr.vmem [resolvable:$true] %s41_s24 }
   0xb   :  { %p834_p1 = scmp.lt.u32.totalorder %s830_s27, %s1411_s1 }
   0xd   :  { %p836_p2 = pnand %p834_p1, %p831_p0 }
   0xf   :  { %839 = shalt.err (!%p836_p2)
}
  0x10   :  { %s840_s13 = scalar_lea.vmem %s42_s24, 1024  ;;  %p845_p4 = scmp.lt.s32.totalorder %s42_s24, %s42_s24 }
  0x11   :  { %p841_p3 = scmp.ne.s32.totalorder %s42_s24, %s840_s13  ;;  %p846_p5 = scmp.lt.s32.totalorder %s840_s13, %s840_s13 }
  0x13   :  { %p847_p6 = por %p846_p5, %p845_p4 }
  0x15   :  { %p848_p7 = pnand %p847_p6, %p841_p3 }
  0x17   :  { %851 = shalt.err (!%p848_p7)
}
  0x18   :  { %s1109_s14 = smov 64   ;;  %s1110_s15 = smov 4  }
  0x19   :  { %47 = dma.hbm_to_vmem [thread:$0]  %s1411_s1, 1024, %s42_s24, [#allocation7], %s1109_s14, %s1109_s14, %s1110_s15  }
  0x1a   :  { %s1111_s18 = smov [#allocation9]   ;;  %s1112_s20 = smov [#allocation12]  }
  0x1b   :  { %s66_s19 = sshll.u32 %s1111_s18, 4  ;;  %s87_s21 = sshll.u32 %s1112_s20, 4  ;;  %s67_s19 = int_to_ptr.vmem [resolvable:$true] %s66_s19  ;;  %s88_s21 = int_to_ptr.vmem [resolvable:$true] %s87_s21 }
  0x1c   :  { %s852_s25 = scalar_lea.hbm %s1413_s3, 64 }
  0x1d   :  { %p853_p8 = scmp.ne.s32.totalorder %s1413_s3, %s852_s25  ;;  %p856_p9 = scmp.lt.u32.totalorder %s852_s25, %s1413_s3 }
  0x1f   :  { %p858_p10 = pnand %p856_p9, %p853_p8 }
  0x21   :  { %861 = shalt.err (!%p858_p10)
}
  0x22   :  { %s862_s1 = scalar_lea.vmem %s67_s19, 64  ;;  %p867_p12 = scmp.lt.s32.totalorder %s67_s19, %s67_s19 }
  0x23   :  { %p863_p11 = scmp.ne.s32.totalorder %s67_s19, %s862_s1  ;;  %p868_p13 = scmp.lt.s32.totalorder %s862_s1, %s862_s1 }
  0x25   :  { %p869_p0 = por %p868_p13, %p867_p12 }
  0x27   :  { %p870_p1 = pnand %p869_p0, %p863_p11 }
  0x29   :  { %873 = shalt.err (!%p870_p1)
}
  0x2a   :  { %69 = dma.hbm_to_vmem [thread:$0]  %s1413_s3, 64, %s67_s19, [#allocation10]  }
  0x2b   :  { %s874_s16 = scalar_lea.hbm %s1415_s5, 256 }
  0x2c   :  { %p875_p2 = scmp.ne.s32.totalorder %s1415_s5, %s874_s16  ;;  %p878_p3 = scmp.lt.u32.totalorder %s874_s16, %s1415_s5 }
  0x2e   :  { %p880_p4 = pnand %p878_p3, %p875_p2 }
  0x30   :  { %883 = shalt.err (!%p880_p4)
}
  0x31   :  { %s884_s23 = scalar_lea.vmem %s88_s21, 256  ;;  %p889_p6 = scmp.lt.s32.totalorder %s88_s21, %s88_s21 }
  0x32   :  { %p885_p5 = scmp.ne.s32.totalorder %s88_s21, %s884_s23  ;;  %p890_p7 = scmp.lt.s32.totalorder %s884_s23, %s884_s23 }
  0x34   :  { %p891_p8 = por %p890_p7, %p889_p6 }
  0x36   :  { %p892_p9 = pnand %p891_p8, %p885_p5 }
  0x38   :  { %895 = shalt.err (!%p892_p9)
}
  0x39   :  { %93 = dma.hbm_to_vmem [thread:$0]  %s1415_s5, 256, %s88_s21, [#allocation13], %s1109_s14, %s1109_s14, %s1110_s15  }
  0x3a   :  { %s1113_s25 = smov [#allocation15]   ;;  %s1114_s27 = smov [#allocation18]  }
  0x3b   :  { %s109_s26 = sshll.u32 %s1113_s25, 4  ;;  %s134_s28 = sshll.u32 %s1114_s27, 4  ;;  %s110_s26 = int_to_ptr.vmem [resolvable:$true] %s109_s26  ;;  %s135_s28 = int_to_ptr.vmem [resolvable:$true] %s134_s28 }
  0x3c   :  { %s896_s24 = scalar_lea.hbm %s1417_s7, 256 }
  0x3d   :  { %p897_p10 = scmp.ne.s32.totalorder %s1417_s7, %s896_s24  ;;  %p900_p11 = scmp.lt.u32.totalorder %s896_s24, %s1417_s7 }
  0x3f   :  { %p902_p12 = pnand %p900_p11, %p897_p10 }
  0x41   :  { %905 = shalt.err (!%p902_p12)
}
  0x42   :  { %s906_s5 = scalar_lea.vmem %s110_s26, 256  ;;  %p911_p0 = scmp.lt.s32.totalorder %s110_s26, %s110_s26 }
  0x43   :  { %p907_p13 = scmp.ne.s32.totalorder %s110_s26, %s906_s5  ;;  %p912_p1 = scmp.lt.s32.totalorder %s906_s5, %s906_s5 }
  0x45   :  { %p913_p2 = por %p912_p1, %p911_p0 }
  0x47   :  { %p914_p3 = pnand %p913_p2, %p907_p13 }
  0x49   :  { %917 = shalt.err (!%p914_p3)
}
  0x4a   :  { %115 = dma.hbm_to_vmem [thread:$0]  %s1417_s7, 256, %s110_s26, [#allocation16], %s1109_s14, %s1109_s14, %s1110_s15  }
  0x4b   :  { %s918_s22 = scalar_lea.hbm %s1419_s9, 64 }
  0x4c   :  { %p919_p4 = scmp.ne.s32.totalorder %s1419_s9, %s918_s22  ;;  %p922_p5 = scmp.lt.u32.totalorder %s918_s22, %s1419_s9 }
  0x4e   :  { %p924_p6 = pnand %p922_p5, %p919_p4 }
  0x50   :  { %927 = shalt.err (!%p924_p6)
}
  0x51   :  { %s928_s27 = scalar_lea.vmem %s135_s28, 64  ;;  %p933_p8 = scmp.lt.s32.totalorder %s135_s28, %s135_s28 }
  0x52   :  { %p929_p7 = scmp.ne.s32.totalorder %s135_s28, %s928_s27  ;;  %p934_p9 = scmp.lt.s32.totalorder %s928_s27, %s928_s27 }
  0x54   :  { %p935_p10 = por %p934_p9, %p933_p8 }
  0x56   :  { %p936_p11 = pnand %p935_p10, %p929_p7 }
  0x58   :  { %939 = shalt.err (!%p936_p11)
}
  0x59   :  { %137 = dma.hbm_to_vmem [thread:$0]  %s1419_s9, 64, %s135_s28, [#allocation19]  }
  0x5a   :  { %s1115_s29 = smov [#allocation3]   ;;  %s1116_s24 = smov [#allocation8]  }
  0x5b   :  { %s32_s1 = sshll.u32 %s1115_s29, 4  ;;  %s53_s11 = sshll.u32 %s1116_s24, 4  ;;  %s33_s1 = int_to_ptr.vmem [resolvable:$true] %s32_s1  ;;  %s54_s11 = int_to_ptr.vmem [resolvable:$true] %s53_s11 }
  0x5c   :  { %s940_s16 = scalar_lea.hbm %s1410_s0, 64 }
  0x5d   :  { %p941_p12 = scmp.ne.s32.totalorder %s1410_s0, %s940_s16  ;;  %p944_p13 = scmp.lt.u32.totalorder %s940_s16, %s1410_s0 }
  0x5f   :  { %p946_p0 = pnand %p944_p13, %p941_p12 }
  0x61   :  { %949 = shalt.err (!%p946_p0)
}
  0x62   :  { %s950_s9 = scalar_lea.vmem %s33_s1, 64  ;;  %p955_p2 = scmp.lt.s32.totalorder %s33_s1, %s33_s1 }
  0x63   :  { %p951_p1 = scmp.ne.s32.totalorder %s33_s1, %s950_s9  ;;  %p956_p3 = scmp.lt.s32.totalorder %s950_s9, %s950_s9 }
  0x65   :  { %p957_p4 = por %p956_p3, %p955_p2 }
  0x67   :  { %p958_p5 = pnand %p957_p4, %p951_p1 }
  0x69   :  { %961 = shalt.err (!%p958_p5)
}
  0x6a   :  { %35 = dma.hbm_to_vmem [thread:$0]  %s1410_s0, 64, %s33_s1, [#allocation4]  }
  0x6b   :  { %s962_s3 = scalar_lea.hbm %s1412_s2, 256 }
  0x6c   :  { %p963_p6 = scmp.ne.s32.totalorder %s1412_s2, %s962_s3  ;;  %p966_p7 = scmp.lt.u32.totalorder %s962_s3, %s1412_s2 }
  0x6e   :  { %p968_p8 = pnand %p966_p7, %p963_p6 }
  0x70   :  { %971 = shalt.err (!%p968_p8)
}
  0x71   :  { %s972_s26 = scalar_lea.vmem %s54_s11, 256  ;;  %p977_p10 = scmp.lt.s32.totalorder %s54_s11, %s54_s11 }
  0x72   :  { %p973_p9 = scmp.ne.s32.totalorder %s54_s11, %s972_s26  ;;  %p978_p11 = scmp.lt.s32.totalorder %s972_s26, %s972_s26 }
  0x74   :  { %p979_p12 = por %p978_p11, %p977_p10 }
  0x76   :  { %p980_p13 = pnand %p979_p12, %p973_p9 }
  0x78   :  { %983 = shalt.err (!%p980_p13)
}
  0x79   :  { %59 = dma.hbm_to_vmem [thread:$0]  %s1412_s2, 256, %s54_s11, [#allocation7], %s1109_s14, %s1109_s14, %s1110_s15  }
  0x7a   :  { %s1117_s1 = smov [#allocation11]   ;;  %s1118_s30 = smov [#allocation14]  }
  0x7b   :  { %s75_s24 = sshll.u32 %s1117_s1, 4  ;;  %s100_s13 = sshll.u32 %s1118_s30, 4  ;;  %s76_s24 = int_to_ptr.vmem [resolvable:$true] %s75_s24  ;;  %s101_s13 = int_to_ptr.vmem [resolvable:$true] %s100_s13 }
  0x7c   :  { %s984_s21 = scalar_lea.hbm %s1414_s4, 256 }
  0x7d   :  { %p985_p0 = scmp.ne.s32.totalorder %s1414_s4, %s984_s21  ;;  %p988_p1 = scmp.lt.u32.totalorder %s984_s21, %s1414_s4 }
  0x7f   :  { %p990_p2 = pnand %p988_p1, %p985_p0 }
  0x81   :  { %993 = shalt.err (!%p990_p2)
}
  0x82   :  { %s994_s2 = scalar_lea.vmem %s76_s24, 256  ;;  %p999_p4 = scmp.lt.s32.totalorder %s76_s24, %s76_s24 }
  0x83   :  { %p995_p3 = scmp.ne.s32.totalorder %s76_s24, %s994_s2  ;;  %p1000_p5 = scmp.lt.s32.totalorder %s994_s2, %s994_s2 }
  0x85   :  { %p1001_p6 = por %p1000_p5, %p999_p4 }
  0x87   :  { %p1002_p7 = pnand %p1001_p6, %p995_p3 }
  0x89   :  { %1005 = shalt.err (!%p1002_p7)
}
  0x8a   :  { %81 = dma.hbm_to_vmem [thread:$0]  %s1414_s4, 256, %s76_s24, [#allocation10], %s1109_s14, %s1109_s14, %s1110_s15  }
  0x8b   :  { %s1006_s3 = scalar_lea.hbm %s1416_s6, 64 }
  0x8c   :  { %p1007_p8 = scmp.ne.s32.totalorder %s1416_s6, %s1006_s3  ;;  %p1010_p9 = scmp.lt.u32.totalorder %s1006_s3, %s1416_s6 }
  0x8e   :  { %p1012_p10 = pnand %p1010_p9, %p1007_p8 }
  0x90   :  { %1015 = shalt.err (!%p1012_p10)
}
  0x91   :  { %s1016_s26 = scalar_lea.vmem %s101_s13, 64  ;;  %p1021_p12 = scmp.lt.s32.totalorder %s101_s13, %s101_s13 }
  0x92   :  { %p1017_p11 = scmp.ne.s32.totalorder %s101_s13, %s1016_s26  ;;  %p1022_p13 = scmp.lt.s32.totalorder %s1016_s26, %s1016_s26 }
  0x94   :  { %p1023_p0 = por %p1022_p13, %p1021_p12 }
  0x96   :  { %p1024_p1 = pnand %p1023_p0, %p1017_p11 }
  0x98   :  { %1027 = shalt.err (!%p1024_p1)
}
  0x99   :  { %103 = dma.hbm_to_vmem [thread:$0]  %s1416_s6, 64, %s101_s13, [#allocation13]  }
  0x9a   :  { %s1119_s29 = smov [#allocation17]   ;;  %s1120_s24 = smov [#allocation20]  }
  0x9b   :  { %s121_s1 = sshll.u32 %s1119_s29, 4  ;;  %s144_s30 = sshll.u32 %s1120_s24, 4  ;;  %s122_s1 = int_to_ptr.vmem [resolvable:$true] %s121_s1  ;;  %s145_s30 = int_to_ptr.vmem [resolvable:$true] %s144_s30 }
  0x9c   :  { %s1028_s21 = scalar_lea.hbm %s1418_s8, 128 }
  0x9d   :  { %p1029_p2 = scmp.ne.s32.totalorder %s1418_s8, %s1028_s21  ;;  %p1032_p3 = scmp.lt.u32.totalorder %s1028_s21, %s1418_s8 }
  0x9f   :  { %p1034_p4 = pnand %p1032_p3, %p1029_p2 }
  0xa1   :  { %1037 = shalt.err (!%p1034_p4)
}
  0xa2   :  { %s1038_s6 = scalar_lea.vmem %s122_s1, 128  ;;  %p1043_p6 = scmp.lt.s32.totalorder %s122_s1, %s122_s1 }
  0xa3   :  { %p1039_p5 = scmp.ne.s32.totalorder %s122_s1, %s1038_s6  ;;  %p1044_p7 = scmp.lt.s32.totalorder %s1038_s6, %s1038_s6 }
  0xa5   :  { %p1045_p8 = por %p1044_p7, %p1043_p6 }
  0xa7   :  { %p1046_p9 = pnand %p1045_p8, %p1039_p5 }
  0xa9   :  { %1049 = shalt.err (!%p1046_p9)
}
  0xaa   :  { %127 = dma.hbm_to_vmem [thread:$0]  %s1418_s8, 128, %s122_s1, [#allocation16], %s1109_s14, %s1109_s14, %s1110_s15  }
  0xab   :  { %s1050_s22 = scalar_lea.hbm %s1420_s10, 16 }
  0xac   :  { %p1051_p10 = scmp.ne.s32.totalorder %s1420_s10, %s1050_s22  ;;  %p1054_p11 = scmp.lt.u32.totalorder %s1050_s22, %s1420_s10 }
  0xae   :  { %p1056_p12 = pnand %p1054_p11, %p1051_p10 }
  0xb0   :  { %1059 = shalt.err (!%p1056_p12)
}
  0xb1   :  { %s1060_s27 = scalar_lea.vmem %s145_s30, 16  ;;  %s1064_s7 = scalar_lea.vmem %s145_s30, 32 }
  0xb2   :  { %p1061_p13 = scmp.ne.s32.totalorder %s145_s30, %s1060_s27  ;;  %p1065_p0 = scmp.lt.s32.totalorder %s145_s30, %s145_s30 }
  0xb3   :  { %p1066_p1 = scmp.lt.s32.totalorder %s1064_s7, %s1060_s27 }
  0xb5   :  { %p1067_p2 = por %p1066_p1, %p1065_p0 }
  0xb7   :  { %p1068_p3 = pnand %p1067_p2, %p1061_p13 }
  0xb9   :  { %1071 = shalt.err (!%p1068_p3)
}
  0xba   :  { %147 = dma.hbm_to_vmem [thread:$0]  %s1420_s10, 16, %s145_s30, [#allocation19]  }
  0xbb   :  { %1094 = dma.done.wait [#allocation4], 64  }
  0xbc   :  { %1095 = vsyncadd [#allocation4], 4294967232 }
  0xbd   :  { %1096 = dma.done.wait [#allocation7], 1280  }
  0xbe   :  { %1097 = vsyncadd [#allocation7], 4294966016 }
  0xbf   :  { %1098 = dma.done.wait [#allocation10], 320  }
  0xc0   :  { %1099 = vsyncadd [#allocation10], 4294966976 }
  0xc1   :  { %1100 = dma.done.wait [#allocation13], 320  }
  0xc2   :  { %1101 = vsyncadd [#allocation13], 4294966976 }
  0xc3   :  { %1102 = dma.done.wait [#allocation16], 384  }
  0xc4   :  { %1103 = vsyncadd [#allocation16], 4294966912 }
  0xc5   :  { %1104 = dma.done.wait [#allocation19], 80  }
  0xc6   :  { %1105 = vsyncadd [#allocation19], 4294967216  ;;  %v1121_v1 = vmov 0.0   ;;  %vm1122_vm0 = vmmov 0   ;;  %v294_v2 = vlaneseq  ;;  %v813_v3 = vld [vmem:[#allocation6] sm:$0xff]   ;;  %v814_v5 = vld [vmem:[#allocation6 + $0x8] sm:$0xff]  }
  0xc7   :  { %735 = vmatprep.subr.bf16.mxu0 %v1121_v1  ;;  %751 = vmatprep.mubr.msk.bf16.mxu0 %vm1122_vm0, %v1121_v1  ;;  %v815_v7 = vld [vmem:[#allocation6 + $0x10] sm:$0xff]   ;;  %v816_v8 = vld [vmem:[#allocation6 + $0x18] sm:$0xff]   ;;  %s1123_s10 = smov 32   ;;  %v817_v11 = vld [vmem:[#allocation6 + $0x20] sm:$0xff]   ;;  %s1124_s15 = smov 96   ;;  %vm326_vm1 = vcmask 261120  }
  0xc8   :  { %755 = vmatprep.subr.bf16.mxu1 %v1121_v1  ;;  %759 = vmatprep.mubr.msk.bf16.mxu1 %vm1122_vm0, %v1121_v1  ;;  %v1352_v4 = vshrl.u32 %v294_v2, 7  ;;  %v205_v9 = vld [vmem:[#allocation9] sm:$0x7]  ;;  %v818_v12 = vld [vmem:[#allocation6 + $0x28] sm:$0xff]   ;;  %v820_v14 = vld [vmem:[#allocation6 + $0x38] sm:$0xff]   ;;  %s1125_s26 = smov 16  }
  0xc9   :  { %736 = vmatpush3.bf16.msra.mxu0 %v813_v3  ;;  %v819_v13 = vld [vmem:[#allocation6 + $0x30] sm:$0xff]   ;;  %v184_v15 = vld [vmem:[#allocation3] sm:$0xf]  ;;  %v821_v16 = vld [vmem:[#allocation8] sm:$0xff]   ;;  %s1126_s4 = smov 112   ;;  %vm597_vm2 = vcmask 130048  }
  0xca   :  { %737 = vmatprep.subr.bf16.mxu0 %v1121_v1  ;;  %v301_v6 = vsub.s32 2, %v1352_v4  ;;  %756 = vmatpush3.bf16.msra.mxu1 %v821_v16  ;;  %v822_v17 = vld [vmem:[#allocation8 + $0x8] sm:$0xff]   ;;  %v1370_v18 = vsub.s32 0, %v1352_v4  ;;  %v823_v29 = vld [vmem:[#allocation11] sm:$0xff]   ;;  %v824_v30 = vld [vmem:[#allocation11 + $0x8] sm:$0xff]   ;;  %v1379_v31 = vsub.s32 1, %v1352_v4 }
  0xcb   :  { %757 = vmatprep.subr.bf16.mxu1 %v1121_v1  ;;  %v825_v41 = vld [vmem:[#allocation12] sm:$0xff]   ;;  %v826_v43 = vld [vmem:[#allocation12 + $0x8] sm:$0xff]   ;;  %v384_v44 = vld [vmem:[#allocation14] sm:$0x7]  ;;  %s1127_s0 = smov [#allocation21]   ;;  %vm666_vm3 = vcmask 7168  }
  0xcc   :  { %v302_v10 = vrot.slane %v205_v9, %v301_v6  ;;  %v297_v19 = vrot.slane %v205_v9, %v1370_v18  ;;  %v313_v32 = vrot.slane %v205_v9, %v1379_v31  ;;  %v389_v45 = vrot.slane %v384_v44, %v1370_v18  ;;  %v827_v53 = vld [vmem:[#allocation15] sm:$0xff]   ;;  %v828_v54 = vld [vmem:[#allocation15 + $0x8] sm:$0xff]   ;;  %v514_v55 = vld [vmem:[#allocation18] sm:$0x7]  ;;  %s674_s29 = sshll.u32 %s1127_s0, 4  ;;  %s675_s29 = int_to_ptr.vmem [resolvable:$true] %s674_s29 }
  0xcd   :  { %738 = vmatpush3.bf16.msra.mxu0 %v814_v5  ;;  %v829_v56 = vld [vmem:[#allocation17] sm:$0xff]   ;;  %v579_v57 = vrot.slane %v514_v55, %v301_v6  ;;  %v450_v58 = vrot.slane %v384_v44, %v1379_v31  ;;  %v574_v3 = vrot.slane %v514_v55, %v1370_v18  ;;  %s1072_s1 = scalar_lea.vmem %s675_s29, 128  ;;  %p1077_p5 = scmp.lt.s32.totalorder %s675_s29, %s675_s29 }
  0xce   :  { %739 = vmatprep.subr.bf16.mxu0 %v1121_v1  ;;  %304 = vrot.lane.b32.xlu0 %v302_v10, %s1123_s10  ;;  %p1073_p4 = scmp.ne.s32.totalorder %s675_s29, %s1072_s1  ;;  %p1078_p6 = scmp.lt.s32.totalorder %s1072_s1, %s1072_s1 }
  0xcf   :  { %758 = vmatpush3.bf16.msra.mxu1 %v822_v17  ;;  %581 = vrot.lane.b32.xlu1 %v579_v57, %s1125_s26 }
  0xd0   :  { %763 = vmatprep.subr.bf16.mxu1 %v1121_v1  ;;  %p1079_p7 = por %p1078_p6, %p1077_p5 }
  0xd1   :  { %740 = vmatpush3.bf16.msra.mxu0 %v815_v7 }
  0xd2   :  { %741 = vmatprep.subr.bf16.mxu0 %v1121_v1  ;;  %p1080_p8 = pnand %p1079_p7, %p1073_p4 }
  0xd5   :  { %742 = vmatpush3.bf16.msra.mxu0 %v816_v8 }
  0xd6   :  { %743 = vmatprep.subr.bf16.mxu0 %v1121_v1 }
  0xd9   :  { %744 = vmatpush3.bf16.msra.mxu0 %v817_v11 }
  0xda   :  { %745 = vmatprep.subr.bf16.mxu0 %v1121_v1 }
  0xdd   :  { %746 = vmatpush3.bf16.msra.mxu0 %v818_v12 }
  0xde   :  { %747 = vmatprep.subr.bf16.mxu0 %v1121_v1 }
  0xe1   :  { %748 = vmatpush3.bf16.msra.mxu0 %v819_v13  ;;  %v590_v13 = vrot.slane %v514_v55, %v1379_v31 }
  0xe2   :  { %749 = vmatprep.subr.bf16.mxu0 %v1121_v1 }
  0xe5   :  { %750 = vmatpush3.bf16.msra.mxu0 %v820_v14 }
  0xe6   :  { %787 = vmatprep.subr.bf16.mxu0 %v1121_v1 }
  0xe8   :  { %752 = vmatmul.mubr.bf16.vlgmr.msra.gmra.mrb[0].mxu0 %v184_v15 }
  0xe9   :  { %789 = vmatprep.mubr.msk.bf16.mxu0 %vm1122_vm0, %v1121_v1  ;;  %788 = vmatpush3.bf16.msra.mxu0 %v829_v56 }
 0x140   :  { %v305_v20 = vpop.permute.xlu0 %304 }
 0x141   :  { %v582_v5 = vpop.permute.xlu1 %581 }
 0x1bb   :  { %v288_v21 = vpop.f32.mrb[0].mxu0 }
 0x1bc   :  { %v298_v22 = vadd.f32 %v297_v19, %v288_v21  ;;  %v307_v23 = vadd.f32 %v305_v20, %v288_v21  ;;  %v753_v24 = vpop.f32.mrb[1].mxu0  ;;  %v710_v21 = vld [vmem:[#allocation20] ss:$0 sm:$0xff] }
 0x1bd   :  { %v291_v25 = vpop.f32.mrb[2].mxu0 }
 0x1be   :  { %v308_v26 = vmax.f32 %v298_v22, 0.0  ;;  %371 = vrot.lane.b32.xlu0 %v307_v23, %s1124_s15  ;;  %v754_v27 = vpop.f32.mrb[3].mxu0  ;;  %v711_v25 = vld [vmem:[#allocation2] ss:$0 sm:$0xff] }
 0x1c0   :  { %v309_v28 = vpack.c.bf16 %v308_v26, %v308_v26 }
 0x1c2   :  { %760 = vmatmul.mubr.msk.bf16.vlgmr.msra.gmra.mrb[0].mxu1 %vm326_vm1, %v309_v28 }
 0x1c3   :  { %767 = vmatprep.mubr.msk.bf16.mxu1 %vm1122_vm0, %v1121_v1  ;;  %764 = vmatpush3.bf16.msra.mxu1 %v823_v29 }
 0x1c4   :  { %765 = vmatprep.subr.bf16.mxu1 %v1121_v1 }
 0x1c7   :  { %766 = vmatpush3.bf16.msra.mxu1 %v824_v30 }
 0x1c8   :  { %771 = vmatprep.subr.bf16.mxu1 %v1121_v1 }
 0x230   :  { %v372_v36 = vpop.permute.xlu0 %371 }
 0x295   :  { %v364_v33 = vpop.f32.mrb[0].mxu1 }
 0x296   :  { %v365_v34 = vadd.f32 %v364_v33, %v313_v32  ;;  %v761_v35 = vpop.f32.mrb[1].mxu1 }
 0x297   :  { %v367_v37 = vpop.f32.mrb[2].mxu1 }
 0x298   :  { %v374_v38 = vadd.f32 %v372_v36, %v365_v34  ;;  %v762_v39 = vpop.f32.mrb[3].mxu1 }
 0x29a   :  { %v375_v40 = vmax.f32 %v374_v38, 0.0 }
 0x29c   :  { %v385_v42 = vpack.c.bf16 %v375_v40, %v375_v40 }
 0x29e   :  { %768 = vmatmul.mubr.msk.bf16.vlgmr.msra.gmra.mrb[4].mxu1 %vm326_vm1, %v385_v42 }
 0x29f   :  { %772 = vmatpush3.bf16.msra.mxu1 %v825_v41  ;;  %775 = vmatprep.mubr.msk.bf16.mxu1 %vm1122_vm0, %v1121_v1 }
 0x2a0   :  { %773 = vmatprep.subr.bf16.mxu1 %v1121_v1 }
 0x2a3   :  { %774 = vmatpush3.bf16.msra.mxu1 %v826_v43 }
 0x2a4   :  { %779 = vmatprep.subr.bf16.mxu1 %v1121_v1 }
 0x371   :  { %v439_v46 = vpop.f32.mrb[4].mxu1 }
 0x372   :  { %v440_v47 = vadd.f32 %v439_v46, %v389_v45  ;;  %v769_v48 = vpop.f32.mrb[5].mxu1 }
 0x373   :  { %v442_v49 = vpop.f32.mrb[6].mxu1 }
 0x374   :  { %v445_v50 = vmax.f32 %v440_v47, 0.0  ;;  %v770_v51 = vpop.f32.mrb[7].mxu1 }
 0x376   :  { %v446_v52 = vpack.c.bf16 %v445_v50, %v445_v50 }
 0x378   :  { %776 = vmatmul.mubr.msk.bf16.vlgmr.msra.gmra.mrb[8].mxu1 %vm326_vm1, %v446_v52 }
 0x379   :  { %783 = vmatprep.mubr.msk.bf16.mxu1 %vm1122_vm0, %v1121_v1  ;;  %780 = vmatpush3.bf16.msra.mxu1 %v827_v53 }
 0x37a   :  { %781 = vmatprep.subr.bf16.mxu1 %v1121_v1 }
 0x37d   :  { %782 = vmatpush3.bf16.msra.mxu1 %v828_v54 }
 0x44b   :  { %v500_v59 = vpop.f32.mrb[8].mxu1 }
 0x44c   :  { %v501_v60 = vadd.f32 %v500_v59, %v450_v58  ;;  %v777_v61 = vpop.f32.mrb[9].mxu1 }
 0x44d   :  { %v503_v62 = vpop.f32.mrb[10].mxu1 }
 0x44e   :  { %v506_v63 = vadd.f32 %v501_v60, %v375_v40  ;;  %v778_v0 = vpop.f32.mrb[11].mxu1 }
 0x450   :  { %v507_v2 = vmax.f32 %v506_v63, 0.0 }
 0x452   :  { %v515_v1 = vpack.c.bf16 %v507_v2, %v507_v2 }
 0x454   :  { %784 = vmatmul.mubr.msk.bf16.vlgmr.msra.gmra.mrb[12].mxu1 %vm326_vm1, %v515_v1 }
 0x527   :  { %v565_v4 = vpop.f32.mrb[12].mxu1 }
 0x528   :  { %v575_v6 = vadd.f32 %v574_v3, %v565_v4  ;;  %v584_v7 = vadd.f32 %v582_v5, %v565_v4  ;;  %v785_v8 = vpop.f32.mrb[13].mxu1 }
 0x529   :  { %v568_v9 = vpop.f32.mrb[14].mxu1 }
 0x52a   :  { %v585_v10 = vmax.f32 %v575_v6, 0.0  ;;  %642 = vrot.lane.b32.xlu1 %v584_v7, %s1126_s4  ;;  %v786_v11 = vpop.f32.mrb[15].mxu1 }
 0x52c   :  { %v586_v12 = vpack.c.bf16 %v585_v10, %v585_v10 }
 0x52e   :  { %790 = vmatmul.mubr.msk.bf16.vlgmr.msra.gmra.mrb[4].mxu0 %vm597_vm2, %v586_v12 }
 0x59c   :  { %v643_v17 = vpop.permute.xlu1 %642 }
 0x601   :  { %v635_v14 = vpop.f32.mrb[4].mxu0 }
 0x602   :  { %v636_v15 = vadd.f32 %v635_v14, %v590_v13  ;;  %v791_v16 = vpop.f32.mrb[5].mxu0 }
 0x603   :  { %v638_v18 = vpop.f32.mrb[6].mxu0 }
 0x604   :  { %v645_v19 = vadd.f32 %v643_v17, %v636_v15  ;;  %v792_v20 = vpop.f32.mrb[7].mxu0 }
 0x606   :  { %v646_v22 = vmax.f32 %v645_v19, 0.0 }
 0x608   :  { %v655_v23 = vmul.f32 %v710_v21, %v646_v22 }
 0x60a   :  { %v656_v24 = vsel %vm597_vm2, %v655_v23, 0.0 }
 0x60b   :  { %657 = vadd.xlane.f32.xlu0 %v656_v24 }
 0x698   :  { %v658_v26 = vpop.xlane.xlu0 %657 }
 0x699   :  { %v665_v27 = vadd.f32 %v711_v25, %v658_v26 }
 0x69b   :  { %667 = vst.msk [vmem:[#allocation21] sm:$0xff] %vm666_vm3, %v665_v27 }
 0x69c   :  { %1083 = shalt.err (!%p1080_p8)
}
 0x69d   :  { %s1084_s16 = scalar_lea.hbm %s1422_s12, 128 }
 0x69e   :  { %p1085_p9 = scmp.ne.s32.totalorder %s1422_s12, %s1084_s16  ;;  %p1088_p10 = scmp.lt.u32.totalorder %s1084_s16, %s1422_s12 }
 0x6a0   :  { %p1090_p11 = pnand %p1088_p10, %p1085_p9 }
 0x6a2   :  { %1093 = shalt.err (!%p1090_p11)
}
 0x6a3   :  { %677 = dma.vmem_to_hbm [thread:$0]  %s675_s29, 128, %s1422_s12, [#allocation5]  }
 0x6a4   :  { %1106 = dma.done.wait [#allocation5], 128  }
 0x6a5   :  { %1107 = vsyncadd [#allocation5], 4294967168 }
 0x6a6   :  { %681 = vsyncpa [#allocation4], 1 }
 0x6a7   :  { %682 = vsyncpa [#allocation7], 1 }
 0x6a8   :  { %683 = vsyncpa [#allocation10], 1 }
 0x6a9   :  { %684 = vsyncpa [#allocation13], 1 }
 0x6aa   :  { %685 = vsyncpa [#allocation16], 1 }
 0x6ab   :  { %686 = vsyncpa [#allocation19], 1 }
 0x6ac   :  { %687 = vsyncpa [#allocation5], 1 }

// kernel: tpu_custom_call.1
= control target key start
LH: loop header
LB: loop body
LE: loop exit
PB: predicated region body
PF: predicated region fallthrough
CT: control target
= control target key end

     0   :  { %s1410_s0 = inlined_call_operand.hbm [shape: bf16[8,128], index: 0, kind: input, shape index: {}]   ;;  %s1411_s1 = inlined_call_operand.hbm [shape: bf16[128,64], index: 1, kind: input, shape index: {}]   ;;  %s1412_s2 = inlined_call_operand.hbm [shape: bf16[32,32], index: 2, kind: input, shape index: {}]   ;;  %s1413_s3 = inlined_call_operand.hbm [shape: f32[3,32], index: 3, kind: input, shape index: {}]   ;;  %s1414_s4 = inlined_call_operand.hbm [shape: bf16[32,32], index: 4, kind: input, shape index: {}]   ;;  %s1415_s5 = inlined_call_operand.hbm [shape: bf16[32,32], index: 5, kind: input, shape index: {}]   ;;  %s1416_s6 = inlined_call_operand.hbm [shape: f32[3,32], index: 6, kind: input, shape index: {}]   ;;  %s1417_s7 = inlined_call_operand.hbm [shape: bf16[32,32], index: 7, kind: input, shape index: {}]   ;;  %s1418_s8 = inlined_call_operand.hbm [shape: bf16[16,16], index: 8, kind: input, shape index: {}]   ;;  %s1419_s9 = inlined_call_operand.hbm [shape: f32[3,16], index: 9, kind: input, shape index: {}]   ;;  %s1420_s10 = inlined_call_operand.hbm [shape: f32[1,16], index: 10, kind: input, shape index: {}]   ;;  %s1421_s11 = inlined_call_operand.<no memory space> [shape: f32[1,1], index: 11, kind: input, shape index: {}]   ;;  %s1422_s12 = inlined_call_operand.hbm [shape: f32[8,1], index: 12, kind: output, shape index: {}]  }
   0x1   :  { %v17_v0 = vstv %s1421_s11 }
   0x2   :  { %18 = vst [vmem:[#allocation2] sm:$0x1] %v17_v0 }
   0x3   :  { %19 = vsyncpa [#allocation4], 0 }
   0x4   :  { %20 = vsyncpa [#allocation7], 0 }
   0x5   :  { %21 = vsyncpa [#allocation10], 0 }
   0x6   :  { %22 = vsyncpa [#allocation13], 0 }
   0x7   :  { %23 = vsyncpa [#allocation16], 0 }
   0x8   :  { %24 = vsyncpa [#allocation19], 0 }
   0x9   :  { %25 = vsyncpa [#allocation5], 0  ;;  %s1108_s23 = smov [#allocation6]   ;;  %s830_s27 = scalar_lea.hbm %s1411_s1, 1024 }
   0xa   :  { %s41_s24 = sshll.u32 %s1108_s23, 4  ;;  %p831_p0 = scmp.ne.s32.totalorder %s1411_s1, %s830_s27  ;;  %s42_s24 = int_to_ptr.vmem [resolvable:$true] %s41_s24 }
   0xb   :  { %p834_p1 = scmp.lt.u32.totalorder %s830_s27, %s1411_s1 }
   0xd   :  { %p836_p2 = pnand %p834_p1, %p831_p0 }
   0xf   :  { %839 = shalt.err (!%p836_p2)
}
  0x10   :  { %s840_s13 = scalar_lea.vmem %s42_s24, 1024  ;;  %p845_p4 = scmp.lt.s32.totalorder %s42_s24, %s42_s24 }
  0x11   :  { %p841_p3 = scmp.ne.s32.totalorder %s42_s24, %s840_s13  ;;  %p846_p5 = scmp.lt.s32.totalorder %s840_s13, %s840_s13 }
  0x13   :  { %p847_p6 = por %p846_p5, %p845_p4 }
  0x15   :  { %p848_p7 = pnand %p847_p6, %p841_p3 }
  0x17   :  { %851 = shalt.err (!%p848_p7)
}
  0x18   :  { %s1109_s14 = smov 64   ;;  %s1110_s15 = smov 4  }
  0x19   :  { %47 = dma.hbm_to_vmem [thread:$0]  %s1411_s1, 1024, %s42_s24, [#allocation7], %s1109_s14, %s1109_s14, %s1110_s15  }
  0x1a   :  { %s1111_s18 = smov [#allocation9]   ;;  %s1112_s20 = smov [#allocation12]  }
  0x1b   :  { %s66_s19 = sshll.u32 %s1111_s18, 4  ;;  %s87_s21 = sshll.u32 %s1112_s20, 4  ;;  %s67_s19 = int_to_ptr.vmem [resolvable:$true] %s66_s19  ;;  %s88_s21 = int_to_ptr.vmem [resolvable:$true] %s87_s21 }
  0x1c   :  { %s852_s25 = scalar_lea.hbm %s1413_s3, 64 }
  0x1d   :  { %p853_p8 = scmp.ne.s32.totalorder %s1413_s3, %s852_s25  ;;  %p856_p9 = scmp.lt.u32.totalorder %s852_s25, %s1413_s3 }
  0x1f   :  { %p858_p10 = pnand %p856_p9, %p853_p8 }
  0x21   :  { %861 = shalt.err (!%p858_p10)
}
  0x22   :  { %s862_s1 = scalar_lea.vmem %s67_s19, 64  ;;  %p867_p12 = scmp.lt.s32.totalorder %s67_s19, %s67_s19 }
  0x23   :  { %p863_p11 = scmp.ne.s32.totalorder %s67_s19, %s862_s1  ;;  %p868_p13 = scmp.lt.s32.totalorder %s862_s1, %s862_s1 }
  0x25   :  { %p869_p0 = por %p868_p13, %p867_p12 }
  0x27   :  { %p870_p1 = pnand %p869_p0, %p863_p11 }
  0x29   :  { %873 = shalt.err (!%p870_p1)
}
  0x2a   :  { %69 = dma.hbm_to_vmem [thread:$0]  %s1413_s3, 64, %s67_s19, [#allocation10]  }
  0x2b   :  { %s874_s16 = scalar_lea.hbm %s1415_s5, 256 }
  0x2c   :  { %p875_p2 = scmp.ne.s32.totalorder %s1415_s5, %s874_s16  ;;  %p878_p3 = scmp.lt.u32.totalorder %s874_s16, %s1415_s5 }
  0x2e   :  { %p880_p4 = pnand %p878_p3, %p875_p2 }
  0x30   :  { %883 = shalt.err (!%p880_p4)
}
  0x31   :  { %s884_s23 = scalar_lea.vmem %s88_s21, 256  ;;  %p889_p6 = scmp.lt.s32.totalorder %s88_s21, %s88_s21 }
  0x32   :  { %p885_p5 = scmp.ne.s32.totalorder %s88_s21, %s884_s23  ;;  %p890_p7 = scmp.lt.s32.totalorder %s884_s23, %s884_s23 }
  0x34   :  { %p891_p8 = por %p890_p7, %p889_p6 }
  0x36   :  { %p892_p9 = pnand %p891_p8, %p885_p5 }
  0x38   :  { %895 = shalt.err (!%p892_p9)
}
  0x39   :  { %93 = dma.hbm_to_vmem [thread:$0]  %s1415_s5, 256, %s88_s21, [#allocation13], %s1109_s14, %s1109_s14, %s1110_s15  }
  0x3a   :  { %s1113_s25 = smov [#allocation15]   ;;  %s1114_s27 = smov [#allocation18]  }
  0x3b   :  { %s109_s26 = sshll.u32 %s1113_s25, 4  ;;  %s134_s28 = sshll.u32 %s1114_s27, 4  ;;  %s110_s26 = int_to_ptr.vmem [resolvable:$true] %s109_s26  ;;  %s135_s28 = int_to_ptr.vmem [resolvable:$true] %s134_s28 }
  0x3c   :  { %s896_s24 = scalar_lea.hbm %s1417_s7, 256 }
  0x3d   :  { %p897_p10 = scmp.ne.s32.totalorder %s1417_s7, %s896_s24  ;;  %p900_p11 = scmp.lt.u32.totalorder %s896_s24, %s1417_s7 }
  0x3f   :  { %p902_p12 = pnand %p900_p11, %p897_p10 }
  0x41   :  { %905 = shalt.err (!%p902_p12)
}
  0x42   :  { %s906_s5 = scalar_lea.vmem %s110_s26, 256  ;;  %p911_p0 = scmp.lt.s32.totalorder %s110_s26, %s110_s26 }
  0x43   :  { %p907_p13 = scmp.ne.s32.totalorder %s110_s26, %s906_s5  ;;  %p912_p1 = scmp.lt.s32.totalorder %s906_s5, %s906_s5 }
  0x45   :  { %p913_p2 = por %p912_p1, %p911_p0 }
  0x47   :  { %p914_p3 = pnand %p913_p2, %p907_p13 }
  0x49   :  { %917 = shalt.err (!%p914_p3)
}
  0x4a   :  { %115 = dma.hbm_to_vmem [thread:$0]  %s1417_s7, 256, %s110_s26, [#allocation16], %s1109_s14, %s1109_s14, %s1110_s15  }
  0x4b   :  { %s918_s22 = scalar_lea.hbm %s1419_s9, 64 }
  0x4c   :  { %p919_p4 = scmp.ne.s32.totalorder %s1419_s9, %s918_s22  ;;  %p922_p5 = scmp.lt.u32.totalorder %s918_s22, %s1419_s9 }
  0x4e   :  { %p924_p6 = pnand %p922_p5, %p919_p4 }
  0x50   :  { %927 = shalt.err (!%p924_p6)
}
  0x51   :  { %s928_s27 = scalar_lea.vmem %s135_s28, 64  ;;  %p933_p8 = scmp.lt.s32.totalorder %s135_s28, %s135_s28 }
  0x52   :  { %p929_p7 = scmp.ne.s32.totalorder %s135_s28, %s928_s27  ;;  %p934_p9 = scmp.lt.s32.totalorder %s928_s27, %s928_s27 }
  0x54   :  { %p935_p10 = por %p934_p9, %p933_p8 }
  0x56   :  { %p936_p11 = pnand %p935_p10, %p929_p7 }
  0x58   :  { %939 = shalt.err (!%p936_p11)
}
  0x59   :  { %137 = dma.hbm_to_vmem [thread:$0]  %s1419_s9, 64, %s135_s28, [#allocation19]  }
  0x5a   :  { %s1115_s29 = smov [#allocation3]   ;;  %s1116_s24 = smov [#allocation8]  }
  0x5b   :  { %s32_s1 = sshll.u32 %s1115_s29, 4  ;;  %s53_s11 = sshll.u32 %s1116_s24, 4  ;;  %s33_s1 = int_to_ptr.vmem [resolvable:$true] %s32_s1  ;;  %s54_s11 = int_to_ptr.vmem [resolvable:$true] %s53_s11 }
  0x5c   :  { %s940_s16 = scalar_lea.hbm %s1410_s0, 64 }
  0x5d   :  { %p941_p12 = scmp.ne.s32.totalorder %s1410_s0, %s940_s16  ;;  %p944_p13 = scmp.lt.u32.totalorder %s940_s16, %s1410_s0 }
  0x5f   :  { %p946_p0 = pnand %p944_p13, %p941_p12 }
  0x61   :  { %949 = shalt.err (!%p946_p0)
}
  0x62   :  { %s950_s9 = scalar_lea.vmem %s33_s1, 64  ;;  %p955_p2 = scmp.lt.s32.totalorder %s33_s1, %s33_s1 }
  0x63   :  { %p951_p1 = scmp.ne.s32.totalorder %s33_s1, %s950_s9  ;;  %p956_p3 = scmp.lt.s32.totalorder %s950_s9, %s950_s9 }
  0x65   :  { %p957_p4 = por %p956_p3, %p955_p2 }
  0x67   :  { %p958_p5 = pnand %p957_p4, %p951_p1 }
  0x69   :  { %961 = shalt.err (!%p958_p5)
}
  0x6a   :  { %35 = dma.hbm_to_vmem [thread:$0]  %s1410_s0, 64, %s33_s1, [#allocation4]  }
  0x6b   :  { %s962_s3 = scalar_lea.hbm %s1412_s2, 256 }
  0x6c   :  { %p963_p6 = scmp.ne.s32.totalorder %s1412_s2, %s962_s3  ;;  %p966_p7 = scmp.lt.u32.totalorder %s962_s3, %s1412_s2 }
  0x6e   :  { %p968_p8 = pnand %p966_p7, %p963_p6 }
  0x70   :  { %971 = shalt.err (!%p968_p8)
}
  0x71   :  { %s972_s26 = scalar_lea.vmem %s54_s11, 256  ;;  %p977_p10 = scmp.lt.s32.totalorder %s54_s11, %s54_s11 }
  0x72   :  { %p973_p9 = scmp.ne.s32.totalorder %s54_s11, %s972_s26  ;;  %p978_p11 = scmp.lt.s32.totalorder %s972_s26, %s972_s26 }
  0x74   :  { %p979_p12 = por %p978_p11, %p977_p10 }
  0x76   :  { %p980_p13 = pnand %p979_p12, %p973_p9 }
  0x78   :  { %983 = shalt.err (!%p980_p13)
}
  0x79   :  { %59 = dma.hbm_to_vmem [thread:$0]  %s1412_s2, 256, %s54_s11, [#allocation7], %s1109_s14, %s1109_s14, %s1110_s15  }
  0x7a   :  { %s1117_s1 = smov [#allocation11]   ;;  %s1118_s30 = smov [#allocation14]  }
  0x7b   :  { %s75_s24 = sshll.u32 %s1117_s1, 4  ;;  %s100_s13 = sshll.u32 %s1118_s30, 4  ;;  %s76_s24 = int_to_ptr.vmem [resolvable:$true] %s75_s24  ;;  %s101_s13 = int_to_ptr.vmem [resolvable:$true] %s100_s13 }
  0x7c   :  { %s984_s21 = scalar_lea.hbm %s1414_s4, 256 }
  0x7d   :  { %p985_p0 = scmp.ne.s32.totalorder %s1414_s4, %s984_s21  ;;  %p988_p1 = scmp.lt.u32.totalorder %s984_s21, %s1414_s4 }
  0x7f   :  { %p990_p2 = pnand %p988_p1, %p985_p0 }
  0x81   :  { %993 = shalt.err (!%p990_p2)
}
  0x82   :  { %s994_s2 = scalar_lea.vmem %s76_s24, 256  ;;  %p999_p4 = scmp.lt.s32.totalorder %s76_s24, %s76_s24 }
  0x83   :  { %p995_p3 = scmp.ne.s32.totalorder %s76_s24, %s994_s2  ;;  %p1000_p5 = scmp.lt.s32.totalorder %s994_s2, %s994_s2 }
  0x85   :  { %p1001_p6 = por %p1000_p5, %p999_p4 }
  0x87   :  { %p1002_p7 = pnand %p1001_p6, %p995_p3 }
  0x89   :  { %1005 = shalt.err (!%p1002_p7)
}
  0x8a   :  { %81 = dma.hbm_to_vmem [thread:$0]  %s1414_s4, 256, %s76_s24, [#allocation10], %s1109_s14, %s1109_s14, %s1110_s15  }
  0x8b   :  { %s1006_s3 = scalar_lea.hbm %s1416_s6, 64 }
  0x8c   :  { %p1007_p8 = scmp.ne.s32.totalorder %s1416_s6, %s1006_s3  ;;  %p1010_p9 = scmp.lt.u32.totalorder %s1006_s3, %s1416_s6 }
  0x8e   :  { %p1012_p10 = pnand %p1010_p9, %p1007_p8 }
  0x90   :  { %1015 = shalt.err (!%p1012_p10)
}
  0x91   :  { %s1016_s26 = scalar_lea.vmem %s101_s13, 64  ;;  %p1021_p12 = scmp.lt.s32.totalorder %s101_s13, %s101_s13 }
  0x92   :  { %p1017_p11 = scmp.ne.s32.totalorder %s101_s13, %s1016_s26  ;;  %p1022_p13 = scmp.lt.s32.totalorder %s1016_s26, %s1016_s26 }
  0x94   :  { %p1023_p0 = por %p1022_p13, %p1021_p12 }
  0x96   :  { %p1024_p1 = pnand %p1023_p0, %p1017_p11 }
  0x98   :  { %1027 = shalt.err (!%p1024_p1)
}
  0x99   :  { %103 = dma.hbm_to_vmem [thread:$0]  %s1416_s6, 64, %s101_s13, [#allocation13]  }
  0x9a   :  { %s1119_s29 = smov [#allocation17]   ;;  %s1120_s24 = smov [#allocation20]  }
  0x9b   :  { %s121_s1 = sshll.u32 %s1119_s29, 4  ;;  %s144_s30 = sshll.u32 %s1120_s24, 4  ;;  %s122_s1 = int_to_ptr.vmem [resolvable:$true] %s121_s1  ;;  %s145_s30 = int_to_ptr.vmem [resolvable:$true] %s144_s30 }
  0x9c   :  { %s1028_s21 = scalar_lea.hbm %s1418_s8, 128 }
  0x9d   :  { %p1029_p2 = scmp.ne.s32.totalorder %s1418_s8, %s1028_s21  ;;  %p1032_p3 = scmp.lt.u32.totalorder %s1028_s21, %s1418_s8 }
  0x9f   :  { %p1034_p4 = pnand %p1032_p3, %p1029_p2 }
  0xa1   :  { %1037 = shalt.err (!%p1034_p4)
}
  0xa2   :  { %s1038_s6 = scalar_lea.vmem %s122_s1, 128  ;;  %p1043_p6 = scmp.lt.s32.totalorder %s122_s1, %s122_s1 }
  0xa3   :  { %p1039_p5 = scmp.ne.s32.totalorder %s122_s1, %s1038_s6  ;;  %p1044_p7 = scmp.lt.s32.totalorder %s1038_s6, %s1038_s6 }
  0xa5   :  { %p1045_p8 = por %p1044_p7, %p1043_p6 }
  0xa7   :  { %p1046_p9 = pnand %p1045_p8, %p1039_p5 }
  0xa9   :  { %1049 = shalt.err (!%p1046_p9)
}
  0xaa   :  { %127 = dma.hbm_to_vmem [thread:$0]  %s1418_s8, 128, %s122_s1, [#allocation16], %s1109_s14, %s1109_s14, %s1110_s15  }
  0xab   :  { %s1050_s22 = scalar_lea.hbm %s1420_s10, 16 }
  0xac   :  { %p1051_p10 = scmp.ne.s32.totalorder %s1420_s10, %s1050_s22  ;;  %p1054_p11 = scmp.lt.u32.totalorder %s1050_s22, %s1420_s10 }
  0xae   :  { %p1056_p12 = pnand %p1054_p11, %p1051_p10 }
  0xb0   :  { %1059 = shalt.err (!%p1056_p12)
}
  0xb1   :  { %s1060_s27 = scalar_lea.vmem %s145_s30, 16  ;;  %s1064_s7 = scalar_lea.vmem %s145_s30, 32 }
  0xb2   :  { %p1061_p13 = scmp.ne.s32.totalorder %s145_s30, %s1060_s27  ;;  %p1065_p0 = scmp.lt.s32.totalorder %s145_s30, %s145_s30 }
  0xb3   :  { %p1066_p1 = scmp.lt.s32.totalorder %s1064_s7, %s1060_s27 }
  0xb5   :  { %p1067_p2 = por %p1066_p1, %p1065_p0 }
  0xb7   :  { %p1068_p3 = pnand %p1067_p2, %p1061_p13 }
  0xb9   :  { %1071 = shalt.err (!%p1068_p3)
}
  0xba   :  { %147 = dma.hbm_to_vmem [thread:$0]  %s1420_s10, 16, %s145_s30, [#allocation19]  }
  0xbb   :  { %1094 = dma.done.wait [#allocation4], 64  }
  0xbc   :  { %1095 = vsyncadd [#allocation4], 4294967232 }
  0xbd   :  { %1096 = dma.done.wait [#allocation7], 1280  }
  0xbe   :  { %1097 = vsyncadd [#allocation7], 4294966016 }
  0xbf   :  { %1098 = dma.done.wait [#allocation10], 320  }
  0xc0   :  { %1099 = vsyncadd [#allocation10], 4294966976 }
  0xc1   :  { %1100 = dma.done.wait [#allocation13], 320  }
  0xc2   :  { %1101 = vsyncadd [#allocation13], 4294966976 }
  0xc3   :  { %1102 = dma.done.wait [#allocation16], 384  }
  0xc4   :  { %1103 = vsyncadd [#allocation16], 4294966912 }
  0xc5   :  { %1104 = dma.done.wait [#allocation19], 80  }
  0xc6   :  { %1105 = vsyncadd [#allocation19], 4294967216  ;;  %v1121_v1 = vmov 0.0   ;;  %vm1122_vm0 = vmmov 0   ;;  %v294_v2 = vlaneseq  ;;  %v813_v3 = vld [vmem:[#allocation6] sm:$0xff]   ;;  %v814_v5 = vld [vmem:[#allocation6 + $0x8] sm:$0xff]  }
  0xc7   :  { %735 = vmatprep.subr.bf16.mxu0 %v1121_v1  ;;  %751 = vmatprep.mubr.msk.bf16.mxu0 %vm1122_vm0, %v1121_v1  ;;  %v815_v7 = vld [vmem:[#allocation6 + $0x10] sm:$0xff]   ;;  %v816_v8 = vld [vmem:[#allocation6 + $0x18] sm:$0xff]   ;;  %s1123_s10 = smov 32   ;;  %v817_v11 = vld [vmem:[#allocation6 + $0x20] sm:$0xff]   ;;  %s1124_s15 = smov 96   ;;  %vm326_vm1 = vcmask 261120  }
  0xc8   :  { %755 = vmatprep.subr.bf16.mxu1 %v1121_v1  ;;  %759 = vmatprep.mubr.msk.bf16.mxu1 %vm1122_vm0, %v1121_v1  ;;  %v1352_v4 = vshrl.u32 %v294_v2, 7  ;;  %v205_v9 = vld [vmem:[#allocation9] sm:$0x7]  ;;  %v818_v12 = vld [vmem:[#allocation6 + $0x28] sm:$0xff]   ;;  %v820_v14 = vld [vmem:[#allocation6 + $0x38] sm:$0xff]   ;;  %s1125_s26 = smov 16  }
  0xc9   :  { %736 = vmatpush3.bf16.msra.mxu0 %v813_v3  ;;  %v819_v13 = vld [vmem:[#allocation6 + $0x30] sm:$0xff]   ;;  %v184_v15 = vld [vmem:[#allocation3] sm:$0xf]  ;;  %v821_v16 = vld [vmem:[#allocation8] sm:$0xff]   ;;  %s1126_s4 = smov 112   ;;  %vm597_vm2 = vcmask 130048  }
  0xca   :  { %737 = vmatprep.subr.bf16.mxu0 %v1121_v1  ;;  %v301_v6 = vsub.s32 2, %v1352_v4  ;;  %756 = vmatpush3.bf16.msra.mxu1 %v821_v16  ;;  %v822_v17 = vld [vmem:[#allocation8 + $0x8] sm:$0xff]   ;;  %v1370_v18 = vsub.s32 0, %v1352_v4  ;;  %v823_v29 = vld [vmem:[#allocation11] sm:$0xff]   ;;  %v824_v30 = vld [vmem:[#allocation11 + $0x8] sm:$0xff]   ;;  %v1379_v31 = vsub.s32 1, %v1352_v4 }
  0xcb   :  { %757 = vmatprep.subr.bf16.mxu1 %v1121_v1  ;;  %v825_v41 = vld [vmem:[#allocation12] sm:$0xff]   ;;  %v826_v43 = vld [vmem:[#allocation12 + $0x8] sm:$0xff]   ;;  %v384_v44 = vld [vmem:[#allocation14] sm:$0x7]  ;;  %s1127_s0 = smov [#allocation21]   ;;  %vm666_vm3 = vcmask 7168  }
  0xcc   :  { %v302_v10 = vrot.slane %v205_v9, %v301_v6  ;;  %v297_v19 = vrot.slane %v205_v9, %v1370_v18  ;;  %v313_v32 = vrot.slane %v205_v9, %v1379_v31  ;;  %v389_v45 = vrot.slane %v384_v44, %v1370_v18  ;;  %v827_v53 = vld [vmem:[#allocation15] sm:$0xff]   ;;  %v828_v54 = vld [vmem:[#allocation15 + $0x8] sm:$0xff]   ;;  %v514_v55 = vld [vmem:[#allocation18] sm:$0x7]  ;;  %s674_s29 = sshll.u32 %s1127_s0, 4  ;;  %s675_s29 = int_to_ptr.vmem [resolvable:$true] %s674_s29 }
  0xcd   :  { %738 = vmatpush3.bf16.msra.mxu0 %v814_v5  ;;  %v829_v56 = vld [vmem:[#allocation17] sm:$0xff]   ;;  %v579_v57 = vrot.slane %v514_v55, %v301_v6  ;;  %v450_v58 = vrot.slane %v384_v44, %v1379_v31  ;;  %v574_v3 = vrot.slane %v514_v55, %v1370_v18  ;;  %s1072_s1 = scalar_lea.vmem %s675_s29, 128  ;;  %p1077_p5 = scmp.lt.s32.totalorder %s675_s29, %s675_s29 }
  0xce   :  { %739 = vmatprep.subr.bf16.mxu0 %v1121_v1  ;;  %304 = vrot.lane.b32.xlu0 %v302_v10, %s1123_s10  ;;  %p1073_p4 = scmp.ne.s32.totalorder %s675_s29, %s1072_s1  ;;  %p1078_p6 = scmp.lt.s32.totalorder %s1072_s1, %s1072_s1 }
  0xcf   :  { %758 = vmatpush3.bf16.msra.mxu1 %v822_v17  ;;  %581 = vrot.lane.b32.xlu1 %v579_v57, %s1125_s26 }
  0xd0   :  { %763 = vmatprep.subr.bf16.mxu1 %v1121_v1  ;;  %p1079_p7 = por %p1078_p6, %p1077_p5 }
  0xd1   :  { %740 = vmatpush3.bf16.msra.mxu0 %v815_v7 }
  0xd2   :  { %741 = vmatprep.subr.bf16.mxu0 %v1121_v1  ;;  %p1080_p8 = pnand %p1079_p7, %p1073_p4 }
  0xd5   :  { %742 = vmatpush3.bf16.msra.mxu0 %v816_v8 }
  0xd6   :  { %743 = vmatprep.subr.bf16.mxu0 %v1121_v1 }
  0xd9   :  { %744 = vmatpush3.bf16.msra.mxu0 %v817_v11 }
  0xda   :  { %745 = vmatprep.subr.bf16.mxu0 %v1121_v1 }
  0xdd   :  { %746 = vmatpush3.bf16.msra.mxu0 %v818_v12 }
  0xde   :  { %747 = vmatprep.subr.bf16.mxu0 %v1121_v1 }
  0xe1   :  { %748 = vmatpush3.bf16.msra.mxu0 %v819_v13  ;;  %v590_v13 = vrot.slane %v514_v55, %v1379_v31 }
  0xe2   :  { %749 = vmatprep.subr.bf16.mxu0 %v1121_v1 }
  0xe5   :  { %750 = vmatpush3.bf16.msra.mxu0 %v820_v14 }
  0xe6   :  { %787 = vmatprep.subr.bf16.mxu0 %v1121_v1 }
  0xe8   :  { %752 = vmatmul.mubr.bf16.vlgmr.msra.gmra.mrb[0].mxu0 %v184_v15 }
  0xe9   :  { %789 = vmatprep.mubr.msk.bf16.mxu0 %vm1122_vm0, %v1121_v1  ;;  %788 = vmatpush3.bf16.msra.mxu0 %v829_v56 }
 0x140   :  { %v305_v20 = vpop.permute.xlu0 %304 }
 0x141   :  { %v582_v5 = vpop.permute.xlu1 %581 }
 0x1bb   :  { %v288_v21 = vpop.f32.mrb[0].mxu0 }
 0x1bc   :  { %v298_v22 = vadd.f32 %v297_v19, %v288_v21  ;;  %v307_v23 = vadd.f32 %v305_v20, %v288_v21  ;;  %v753_v24 = vpop.f32.mrb[1].mxu0  ;;  %v710_v21 = vld [vmem:[#allocation20] ss:$0 sm:$0xff] }
 0x1bd   :  { %v291_v25 = vpop.f32.mrb[2].mxu0 }
 0x1be   :  { %v308_v26 = vmax.f32 %v298_v22, 0.0  ;;  %371 = vrot.lane.b32.xlu0 %v307_v23, %s1124_s15  ;;  %v754_v27 = vpop.f32.mrb[3].mxu0  ;;  %v711_v25 = vld [vmem:[#allocation2] ss:$0 sm:$0xff] }
 0x1c0   :  { %v309_v28 = vpack.c.bf16 %v308_v26, %v308_v26 }
 0x1c2   :  { %760 = vmatmul.mubr.msk.bf16.vlgmr.msra.gmra.mrb[0].mxu1 %vm326_vm1, %v309_v28 }
 0x1c3   :  { %767 = vmatprep.mubr.msk.bf16.mxu1 %vm1122_vm0, %v1121_v1  ;;  %764 = vmatpush3.bf16.msra.mxu1 %v823_v29 }
 0x1c4   :  { %765 = vmatprep.subr.bf16.mxu1 %v1121_v1 }
 0x1c7   :  { %766 = vmatpush3.bf16.msra.mxu1 %v824_v30 }
 0x1c8   :  { %771 = vmatprep.subr.bf16.mxu1 %v1121_v1 }
 0x230   :  { %v372_v36 = vpop.permute.xlu0 %371 }
 0x295   :  { %v364_v33 = vpop.f32.mrb[0].mxu1 }
 0x296   :  { %v365_v34 = vadd.f32 %v364_v33, %v313_v32  ;;  %v761_v35 = vpop.f32.mrb[1].mxu1 }
 0x297   :  { %v367_v37 = vpop.f32.mrb[2].mxu1 }
 0x298   :  { %v374_v38 = vadd.f32 %v372_v36, %v365_v34  ;;  %v762_v39 = vpop.f32.mrb[3].mxu1 }
 0x29a   :  { %v375_v40 = vmax.f32 %v374_v38, 0.0 }
 0x29c   :  { %v385_v42 = vpack.c.bf16 %v375_v40, %v375_v40 }
 0x29e   :  { %768 = vmatmul.mubr.msk.bf16.vlgmr.msra.gmra.mrb[4].mxu1 %vm326_vm1, %v385_v42 }
 0x29f   :  { %772 = vmatpush3.bf16.msra.mxu1 %v825_v41  ;;  %775 = vmatprep.mubr.msk.bf16.mxu1 %vm1122_vm0, %v1121_v1 }
 0x2a0   :  { %773 = vmatprep.subr.bf16.mxu1 %v1121_v1 }
 0x2a3   :  { %774 = vmatpush3.bf16.msra.mxu1 %v826_v43 }
 0x2a4   :  { %779 = vmatprep.subr.bf16.mxu1 %v1121_v1 }
 0x371   :  { %v439_v46 = vpop.f32.mrb[4].mxu1 }
 0x372   :  { %v440_v47 = vadd.f32 %v439_v46, %v389_v45  ;;  %v769_v48 = vpop.f32.mrb[5].mxu1 }
 0x373   :  { %v442_v49 = vpop.f32.mrb[6].mxu1 }
 0x374   :  { %v445_v50 = vmax.f32 %v440_v47, 0.0  ;;  %v770_v51 = vpop.f32.mrb[7].mxu1 }
 0x376   :  { %v446_v52 = vpack.c.bf16 %v445_v50, %v445_v50 }
 0x378   :  { %776 = vmatmul.mubr.msk.bf16.vlgmr.msra.gmra.mrb[8].mxu1 %vm326_vm1, %v446_v52 }
 0x379   :  { %783 = vmatprep.mubr.msk.bf16.mxu1 %vm1122_vm0, %v1121_v1  ;;  %780 = vmatpush3.bf16.msra.mxu1 %v827_v53 }
 0x37a   :  { %781 = vmatprep.subr.bf16.mxu1 %v1121_v1 }
 0x37d   :  { %782 = vmatpush3.bf16.msra.mxu1 %v828_v54 }
 0x44b   :  { %v500_v59 = vpop.f32.mrb[8].mxu1 }
 0x44c   :  { %v501_v60 = vadd.f32 %v500_v59, %v450_v58  ;;  %v777_v61 = vpop.f32.mrb[9].mxu1 }
 0x44d   :  { %v503_v62 = vpop.f32.mrb[10].mxu1 }
 0x44e   :  { %v506_v63 = vadd.f32 %v501_v60, %v375_v40  ;;  %v778_v0 = vpop.f32.mrb[11].mxu1 }
 0x450   :  { %v507_v2 = vmax.f32 %v506_v63, 0.0 }
 0x452   :  { %v515_v1 = vpack.c.bf16 %v507_v2, %v507_v2 }
 0x454   :  { %784 = vmatmul.mubr.msk.bf16.vlgmr.msra.gmra.mrb[12].mxu1 %vm326_vm1, %v515_v1 }
 0x527   :  { %v565_v4 = vpop.f32.mrb[12].mxu1 }
 0x528   :  { %v575_v6 = vadd.f32 %v574_v3, %v565_v4  ;;  %v584_v7 = vadd.f32 %v582_v5, %v565_v4  ;;  %v785_v8 = vpop.f32.mrb[13].mxu1 }
 0x529   :  { %v568_v9 = vpop.f32.mrb[14].mxu1 }
 0x52a   :  { %v585_v10 = vmax.f32 %v575_v6, 0.0  ;;  %642 = vrot.lane.b32.xlu1 %v584_v7, %s1126_s4  ;;  %v786_v11 = vpop.f32.mrb[15].mxu1 }
 0x52c   :  { %v586_v12 = vpack.c.bf16 %v585_v10, %v585_v10 }
 0x52e   :  { %790 = vmatmul.mubr.msk.bf16.vlgmr.msra.gmra.mrb[4].mxu0 %vm597_vm2, %v586_v12 }
 0x59c   :  { %v643_v17 = vpop.permute.xlu1 %642 }
 0x601   :  { %v635_v14 = vpop.f32.mrb[4].mxu0 }
 0x602   :  { %v636_v15 = vadd.f32 %v635_v14, %v590_v13  ;;  %v791_v16 = vpop.f32.mrb[5].mxu0 }
 0x603   :  { %v638_v18 = vpop.f32.mrb[6].mxu0 }
 0x604   :  { %v645_v19 = vadd.f32 %v643_v17, %v636_v15  ;;  %v792_v20 = vpop.f32.mrb[7].mxu0 }
 0x606   :  { %v646_v22 = vmax.f32 %v645_v19, 0.0 }
 0x608   :  { %v655_v23 = vmul.f32 %v710_v21, %v646_v22 }
 0x60a   :  { %v656_v24 = vsel %vm597_vm2, %v655_v23, 0.0 }
 0x60b   :  { %657 = vadd.xlane.f32.xlu0 %v656_v24 }
 0x698   :  { %v658_v26 = vpop.xlane.xlu0 %657 }
 0x699   :  { %v665_v27 = vadd.f32 %v711_v25, %v658_v26 }
 0x69b   :  { %667 = vst.msk [vmem:[#allocation21] sm:$0xff] %vm666_vm3, %v665_v27 }
 0x69c   :  { %1083 = shalt.err (!%p1080_p8)
}
 0x69d   :  { %s1084_s16 = scalar_lea.hbm %s1422_s12, 128 }
 0x69e   :  { %p1085_p9 = scmp.ne.s32.totalorder %s1422_s12, %s1084_s16  ;;  %p1088_p10 = scmp.lt.u32.totalorder %s1084_s16, %s1422_s12 }
 0x6a0   :  { %p1090_p11 = pnand %p1088_p10, %p1085_p9 }
 0x6a2   :  { %1093 = shalt.err (!%p1090_p11)
}
 0x6a3   :  { %677 = dma.vmem_to_hbm [thread:$0]  %s675_s29, 128, %s1422_s12, [#allocation5]  }
 0x6a4   :  { %1106 = dma.done.wait [#allocation5], 128  }
 0x6a5   :  { %1107 = vsyncadd [#allocation5], 4294967168 }
 0x6a6   :  { %681 = vsyncpa [#allocation4], 1 }
 0x6a7   :  { %682 = vsyncpa [#allocation7], 1 }
 0x6a8   :  { %683 = vsyncpa [#allocation10], 1 }
 0x6a9   :  { %684 = vsyncpa [#allocation13], 1 }
 0x6aa   :  { %685 = vsyncpa [#allocation16], 1 }
 0x6ab   :  { %686 = vsyncpa [#allocation19], 1 }
 0x6ac   :  { %687 = vsyncpa [#allocation5], 1 }

</bundles_post_ra>
